<compile_context>
chip_gen: v6e
topology: v6e:2x2x1
jax: 0.10.0
libtpu: 0.0.40
codegen_flags: <defaults>
</compile_context>

<pallas_src>
import functools

import jax
import jax.numpy as jnp
from jax.experimental import pallas as pl
from jax.experimental.pallas import tpu as pltpu

D_MODEL = 6
N_HEADS = 6
HEAD_DIM = D_MODEL // N_HEADS          # = 1
D_FF = 2048                            # nn.TransformerEncoderLayer default dim_feedforward
LN_EPS = 1e-5
N_CLASSES = 3

# Row layout of the packed small-parameter tile (sublane-aligned matrix starts).
_ROW_WQKV = 0                          # rows 0:6,  cols 0:18
_ROW_WO = 8                            # rows 8:14, cols 0:6
_ROW_BQKV = 16                         # cols 0:18
_ROW_BO = 17                           # cols 0:6
_ROW_G1 = 18
_ROW_BE1 = 19
_ROW_G2 = 20
_ROW_BE2 = 21
_ROW_B2 = 22
PACK_ROWS = 24                         # multiple of 8 -> no hidden sublane padding


def _layer_norm(x, g, b):
    mu = jnp.mean(x, axis=-1, keepdims=True)
    xc = x - mu
    var = jnp.mean(xc * xc, axis=-1, keepdims=True)
    return xc * jax.lax.rsqrt(var + LN_EPS) * g + b


# ---------------------------------------------------------------------------
# Single fused kernel: grid over encoder layers, head fused at the last step.
# ---------------------------------------------------------------------------
def _encoder_kernel(attn_len, seq_len,
                    x_ref, pk_ref, w1b_ref, w2_ref, hwb_ref,
                    o_ref,
                    x_sc, attn_sc):
    L, N, D = attn_len, seq_len, D_MODEL
    layer = pl.program_id(0)

    # Load the input slab into the carried VMEM scratch at the first layer.
    @pl.when(layer == 0)
    def _():
        x_sc[...] = x_ref[...]

    x = x_sc[...]                                    # (L*N, D) float32

    # ---- unpack the small per-layer parameter tile (one DMA stream) ----
    wqkv = pk_ref[_ROW_WQKV:_ROW_WQKV + D, 0:3 * D]  # (6, 18)
    wo = pk_ref[_ROW_WO:_ROW_WO + D, 0:D]            # (6, 6)
    bqkv = pk_ref[_ROW_BQKV:_ROW_BQKV + 1, 0:3 * D]  # (1, 18)
    bo = pk_ref[_ROW_BO:_ROW_BO + 1, 0:D]
    g1 = pk_ref[_ROW_G1:_ROW_G1 + 1, 0:D]
    be1 = pk_ref[_ROW_BE1:_ROW_BE1 + 1, 0:D]
    g2 = pk_ref[_ROW_G2:_ROW_G2 + 1, 0:D]
    be2 = pk_ref[_ROW_BE2:_ROW_BE2 + 1, 0:D]
    b2 = pk_ref[_ROW_B2:_ROW_B2 + 1, 0:D]

    # ---- fused Q/K/V projection: one (L*N, 6) @ (6, 18) matmul ----
    qkv = jnp.dot(x, wqkv, preferred_element_type=jnp.float32) + bqkv
    q = qkv[:, 0:D]                                  # scale == 1.0 (head_dim == 1)
    if HEAD_DIM != 1:
        q = q * (1.0 / (HEAD_DIM ** 0.5))
    k = qkv[:, D:2 * D]
    v = qkv[:, 2 * D:3 * D]

    # ---- self-attention over axis 0 (nhead=6, head_dim=1) ----
    # head_dim == 1 => per-head score is an elementwise product; softmax over
    # the L "sequence" blocks, results written straight into a VMEM slab.
    for i in range(L):
        qi = q[i * N:(i + 1) * N, :]                 # (N, D)
        scores = [qi * k[j * N:(j + 1) * N, :] for j in range(L)]
        m = scores[0]
        for j in range(1, L):
            m = jnp.maximum(m, scores[j])
        num = jnp.zeros_like(qi)
        den = jnp.zeros_like(qi)
        for j in range(L):
            e = jnp.exp(scores[j] - m)
            den = den + e
            num = num + e * v[j * N:(j + 1) * N, :]
        attn_sc[i * N:(i + 1) * N, :] = num / den

    attn = jnp.dot(attn_sc[...], wo, preferred_element_type=jnp.float32) + bo

    # residual + LayerNorm (post-norm, PyTorch default norm_first=False)
    x = _layer_norm(x + attn, g1, be1)

    # ---- feed-forward: relu(x @ W1 + b1) @ W2^T + b2 ----
    # W1 and b1 share one (7, 2048) tile; W2 is lane-major (6, 2048) and the
    # contraction runs over the 2048 axis (A @ B^T) to avoid 16x lane padding.
    w1 = w1b_ref[0:D, :]                             # (6, 2048)
    b1 = w1b_ref[D:D + 1, :]                         # (1, 2048)
    h = jnp.maximum(
        jnp.dot(x, w1, preferred_element_type=jnp.float32) + b1, 0.0)
    ff = jax.lax.dot_general(h, w2_ref[...],
                             dimension_numbers=(((1,), (1,)), ((), ())),
                             preferred_element_type=jnp.float32) + b2
    x = _layer_norm(x + ff, g2, be2)

    # carry to next layer
    x_sc[...] = x

    # ---- fused head at the last layer: Flatten -> Linear(S*6, 3) -> Softmax ----
    @pl.when(layer == pl.num_programs(0) - 1)
    def _():
        for b in range(L):
            xb = x[b * N:(b + 1) * N, :]             # (N, D) rows of "batch" b
            acc = hwb_ref[N * D:N * D + 1, :]        # (1, 3) head bias row
            for s in range(N):
                # logits[b] = bias + sum_s xb[s, :] @ HW[s*6:(s+1)*6, :]
                acc = acc + jnp.dot(xb[s:s + 1, :],
                                    hwb_ref[s * D:(s + 1) * D, :],
                                    preferred_element_type=jnp.float32)
            mx = jnp.max(acc, axis=1, keepdims=True)
            e = jnp.exp(acc - mx)
            o_ref[b:b + 1, :] = e / jnp.sum(e, axis=1, keepdims=True)


# ---------------------------------------------------------------------------
# Parameter packing (layout plumbing done once, outside the kernel).
# ---------------------------------------------------------------------------
def _pack_params(p, n_layers):
    d = D_MODEL
    pk = jnp.zeros((n_layers, PACK_ROWS, 3 * d), jnp.float32)
    pk = pk.at[:, _ROW_WQKV:_ROW_WQKV + d, :].set(p["wqkv"])
    pk = pk.at[:, _ROW_WO:_ROW_WO + d, 0:d].set(p["wo"])
    pk = pk.at[:, _ROW_BQKV, :].set(p["bqkv"][:, 0, :])
    pk = pk.at[:, _ROW_BO, 0:d].set(p["bo"][:, 0, :])
    pk = pk.at[:, _ROW_G1, 0:d].set(p["g1"][:, 0, :])
    pk = pk.at[:, _ROW_BE1, 0:d].set(p["be1"][:, 0, :])
    pk = pk.at[:, _ROW_G2, 0:d].set(p["g2"][:, 0, :])
    pk = pk.at[:, _ROW_BE2, 0:d].set(p["be2"][:, 0, :])
    pk = pk.at[:, _ROW_B2, 0:d].set(p["b2"][:, 0, :])
    w1b = jnp.concatenate([p["w1"], p["b1"]], axis=1)        # (nl, 7, 2048)
    hwb = jnp.concatenate([p["hw"], p["hb"]], axis=0)        # (S*6 + 1, 3)
    return pk, w1b, hwb


# ---------------------------------------------------------------------------
# Wrapper
# ---------------------------------------------------------------------------
def transformer_forward(x, params, n_layers):
    B, S, D = x.shape
    assert D == D_MODEL
    x2 = x.astype(jnp.float32).reshape(B * S, D)     # row-major (B, S, D) -> (B*S, D)

    packed, w1b, hwb = _pack_params(params, n_layers)

    def per_layer(shape):
        zeros = (0,) * len(shape)
        # squeeze the stacked-layer axis; index it with the grid position.
        return pl.BlockSpec((None,) + shape, lambda l: (l,) + zeros)

    def whole(shape):
        zeros = (0,) * len(shape)
        return pl.BlockSpec(shape, lambda l: zeros)

    in_specs = [
        whole((B * S, D)),                           # x slab
        per_layer((PACK_ROWS, 3 * D)),               # packed Wqkv/Wo/biases/LN params
        per_layer((D + 1, D_FF)),                    # W1 ++ b1
        per_layer((D, D_FF)),                        # W2  (lane-major)
        whole((S * D + 1, N_CLASSES)),               # head W ++ head b
    ]

    grid_spec = pltpu.PrefetchScalarGridSpec(
        num_scalar_prefetch=0,
        grid=(n_layers,),
        in_specs=in_specs,
        out_specs=pl.BlockSpec((B, N_CLASSES), lambda l: (0, 0)),
        scratch_shapes=[pltpu.VMEM((B * S, D), jnp.float32),   # activation carry
                        pltpu.VMEM((B * S, D), jnp.float32)],  # attention slab
    )

    flops = n_layers * (2 * B * S * D * 3 * D       # qkv
                        + 6 * B * B * S * D         # attention (approx)
                        + 2 * B * S * D * D         # out proj
                        + 4 * B * S * D * D_FF)     # feed-forward
    flops += 2 * B * S * D * N_CLASSES              # head
    transcendentals = n_layers * B * B * S * D + B * N_CLASSES
    param_bytes = 4 * (PACK_ROWS * 3 * D + (D + 1) * D_FF + D * D_FF)
    bytes_accessed = (n_layers * param_bytes + 4 * B * S * D
                      + 4 * (S * D + 1) * N_CLASSES + 4 * B * N_CLASSES)

    return pl.pallas_call(
        functools.partial(_encoder_kernel, B, S),
        out_shape=jax.ShapeDtypeStruct((B, N_CLASSES), jnp.float32),
        grid_spec=grid_spec,
        compiler_params=pltpu.CompilerParams(
            dimension_semantics=("arbitrary",),       # layers carry a dependency
            vmem_limit_bytes=32 * 1024 * 1024),
        cost_estimate=pl.CostEstimate(flops=flops,
                                      transcendentals=transcendentals,
                                      bytes_accessed=bytes_accessed),
    )(x2, packed, w1b, params["w2"], hwb)


# ---------------------------------------------------------------------------
# Deterministic parameter initialization (shapes match the PyTorch module).
# Weights are stored in (in_features, out_features) layout except W2, which is
# kept lane-major (d_model, dim_ff) — PyTorch's native linear2.weight layout —
# and contracted as A @ W2^T inside the kernel.
# ---------------------------------------------------------------------------
def init_params(key, n_layers, seq_len):
    d = D_MODEL

    def uniform(key, shape, bound):
        return jax.random.uniform(key, shape, jnp.float32, -bound, bound)

    keys = iter(jax.random.split(key, 8 * n_layers + 2))
    wqkv, bqkv, wo, bo = [], [], [], []
    g1, be1, g2, be2 = [], [], [], []
    w1, b1, w2, b2 = [], [], [], []

    for _ in range(n_layers):
        b_attn = (6.0 / (4 * d)) ** 0.5              # xavier-ish
        wqkv.append(uniform(next(keys), (d, 3 * d), b_attn))
        bqkv.append(uniform(next(keys), (1, 3 * d), 0.1))
        wo.append(uniform(next(keys), (d, d), 1.0 / d ** 0.5))
        bo.append(uniform(next(keys), (1, d), 1.0 / d ** 0.5))
        g1.append(jnp.ones((1, d), jnp.float32))
        be1.append(jnp.zeros((1, d), jnp.float32))
        g2.append(jnp.ones((1, d), jnp.float32))
        be2.append(jnp.zeros((1, d), jnp.float32))
        w1.append(uniform(next(keys), (d, D_FF), 1.0 / d ** 0.5))
        b1.append(uniform(next(keys), (1, D_FF), 1.0 / d ** 0.5))
        w2.append(uniform(next(keys), (d, D_FF), 1.0 / D_FF ** 0.5))   # lane-major
        b2.append(uniform(next(keys), (1, d), 1.0 / D_FF ** 0.5))

    hw = uniform(next(keys), (seq_len * d, N_CLASSES), 1.0 / (seq_len * d) ** 0.5)
    hb = uniform(next(keys), (1, N_CLASSES), 1.0 / (seq_len * d) ** 0.5)

    stack = lambda xs: jnp.stack(xs, axis=0)
    return {
        "wqkv": stack(wqkv), "bqkv": stack(bqkv),
        "wo": stack(wo), "bo": stack(bo),
        "g1": stack(g1), "be1": stack(be1), "g2": stack(g2), "be2": stack(be2),
        "w1": stack(w1), "b1": stack(b1), "w2": stack(w2), "b2": stack(b2),
        "hw": hw, "hb": hb,
    }


# ---------------------------------------------------------------------------
# Pure-JAX reference (mirrors the PyTorch forward with dropout=0.0, eval mode)
# ---------------------------------------------------------------------------
def reference_forward(x, p, n_layers):
    B, S, D = x.shape
    h = x.astype(jnp.float32)
    for l in range(n_layers):
        qkv = h @ p["wqkv"][l] + p["bqkv"][l]
        q, k, v = qkv[..., :D], qkv[..., D:2 * D], qkv[..., 2 * D:]
        q = q / (HEAD_DIM ** 0.5)
        scores = jnp.einsum("isd,jsd->ijsd", q, k)       # attention over axis 0
        attn_w = jax.nn.softmax(scores, axis=1)
        attn = jnp.einsum("ijsd,jsd->isd", attn_w, v)
        attn = attn @ p["wo"][l] + p["bo"][l]
        h = _layer_norm(h + attn, p["g1"][l], p["be1"][l])
        hh = jnp.maximum(h @ p["w1"][l] + p["b1"][l], 0.0)
        ff = jnp.einsum("isf,df->isd", hh, p["w2"][l]) + p["b2"][l]
        h = _layer_norm(h + ff, p["g2"][l], p["be2"][l])
    flat = h.reshape(B, S * D)
    logits = flat @ p["hw"] + p["hb"]
    return jax.nn.softmax(logits, axis=1)


if __name__ == "__main__":
    n_layers = 2
    dropout = 0.0        # eval semantics
    seq_len = 8
    batch = 2

    key = jax.random.PRNGKey(0)
    kx, kp = jax.random.split(key)
    x = jax.random.normal(kx, (batch, seq_len, D_MODEL), dtype=jnp.float32)
    params = init_params(kp, n_layers, seq_len)

    out = transformer_forward(x, params, n_layers)
    out = jax.block_until_ready(out)

    ref = reference_forward(x, params, n_layers)
    assert out.shape == (batch, N_CLASSES)
    assert jnp.allclose(jnp.sum(out, axis=1), 1.0, atol=1e-4)
    assert jnp.allclose(out, ref, atol=1e-3, rtol=1e-3), (out, ref)

    print("KERNEL_OK")
</pallas_src>

<mosaic_0001>
module attributes {stable_mosaic.version = 11 : i64} {
  func.func @_encoder_kernel(%arg0: i32, %arg1: memref<16x6xf32, #tpu.memory_space<vmem>>, %arg2: memref<1x24x18xf32, #tpu.memory_space<vmem>>, %arg3: memref<1x7x2048xf32, #tpu.memory_space<vmem>>, %arg4: memref<1x6x2048xf32, #tpu.memory_space<vmem>>, %arg5: memref<49x3xf32, #tpu.memory_space<vmem>>, %arg6: memref<2x3xf32, #tpu.memory_space<vmem>>, %arg7: memref<16x6xf32, #tpu.memory_space<vmem>>, %arg8: memref<16x6xf32, #tpu.memory_space<vmem>>) attributes {dimension_semantics = [#tpu.dimension_semantics<arbitrary>], iteration_bounds = array<i64: 2>, scalar_prefetch = 0 : i64, scratch_operands = 2 : i64, tpu.core_type = #tpu.core_type<tc>, window_params = [{pipeline_mode = #tpu.pipeline_mode<synchronous>, transform_indices = @transform_0, window_bounds = array<i64: 16, 6>}, {transform_indices = @transform_1, window_bounds = array<i64: 1, 24, 18>}, {transform_indices = @transform_2, window_bounds = array<i64: 1, 7, 2048>}, {transform_indices = @transform_3, window_bounds = array<i64: 1, 6, 2048>}, {pipeline_mode = #tpu.pipeline_mode<synchronous>, transform_indices = @transform_4, window_bounds = array<i64: 49, 3>}, {pipeline_mode = #tpu.pipeline_mode<synchronous>, transform_indices = @transform_5, window_bounds = array<i64: 2, 3>}]} {
    %c0_i32 = arith.constant 0 : i32
    %0 = arith.cmpi eq, %arg0, %c0_i32 : i32
    %1 = arith.extui %0 : i1 to i32
    %c0_i32_0 = arith.constant 0 : i32
    %2 = arith.cmpi ne, %1, %c0_i32_0 : i32
    scf.if %2 {
      %c0_56 = arith.constant 0 : index
      %c0_57 = arith.constant 0 : index
      %136 = vector.load %arg1[%c0_56, %c0_57] : memref<16x6xf32, #tpu.memory_space<vmem>>, vector<16x6xf32>
      %c0_58 = arith.constant 0 : index
      %c0_59 = arith.constant 0 : index
      %137 = vector.load %arg7[%c0_58, %c0_59] : memref<16x6xf32, #tpu.memory_space<vmem>>, vector<16x6xf32>
      tpu.vector_store %arg7[%c0_58, %c0_59], %136 {strides = array<i32>} : memref<16x6xf32, #tpu.memory_space<vmem>>, vector<16x6xf32>,
    } else {
    }
    %c0 = arith.constant 0 : index
    %c0_1 = arith.constant 0 : index
    %3 = vector.load %arg7[%c0, %c0_1] : memref<16x6xf32, #tpu.memory_space<vmem>>, vector<16x6xf32>
    %c0_2 = arith.constant 0 : index
    %c0_3 = arith.constant 0 : index
    %c0_4 = arith.constant 0 : index
    %4 = vector.load %arg2[%c0_2, %c0_3, %c0_4] : memref<1x24x18xf32, #tpu.memory_space<vmem>>, vector<1x6x18xf32>
    %5 = vector.shape_cast %4 : vector<1x6x18xf32> to vector<6x18xf32>
    %c0_5 = arith.constant 0 : index
    %c8 = arith.constant 8 : index
    %c0_6 = arith.constant 0 : index
    %6 = vector.load %arg2[%c0_5, %c8, %c0_6] : memref<1x24x18xf32, #tpu.memory_space<vmem>>, vector<1x6x6xf32>
    %7 = vector.shape_cast %6 : vector<1x6x6xf32> to vector<6x6xf32>
    %c0_7 = arith.constant 0 : index
    %c16 = arith.constant 16 : index
    %c0_8 = arith.constant 0 : index
    %8 = vector.load %arg2[%c0_7, %c16, %c0_8] : memref<1x24x18xf32, #tpu.memory_space<vmem>>, vector<1x1x18xf32>
    %9 = vector.shape_cast %8 : vector<1x1x18xf32> to vector<1x18xf32>
    %c0_9 = arith.constant 0 : index
    %c17 = arith.constant 17 : index
    %c0_10 = arith.constant 0 : index
    %10 = vector.load %arg2[%c0_9, %c17, %c0_10] : memref<1x24x18xf32, #tpu.memory_space<vmem>>, vector<1x1x6xf32>
    %11 = vector.shape_cast %10 : vector<1x1x6xf32> to vector<1x6xf32>
    %c0_11 = arith.constant 0 : index
    %c18 = arith.constant 18 : index
    %c0_12 = arith.constant 0 : index
    %12 = vector.load %arg2[%c0_11, %c18, %c0_12] : memref<1x24x18xf32, #tpu.memory_space<vmem>>, vector<1x1x6xf32>
    %13 = vector.shape_cast %12 : vector<1x1x6xf32> to vector<1x6xf32>
    %c0_13 = arith.constant 0 : index
    %c19 = arith.constant 19 : index
    %c0_14 = arith.constant 0 : index
    %14 = vector.load %arg2[%c0_13, %c19, %c0_14] : memref<1x24x18xf32, #tpu.memory_space<vmem>>, vector<1x1x6xf32>
    %15 = vector.shape_cast %14 : vector<1x1x6xf32> to vector<1x6xf32>
    %c0_15 = arith.constant 0 : index
    %c20 = arith.constant 20 : index
    %c0_16 = arith.constant 0 : index
    %16 = vector.load %arg2[%c0_15, %c20, %c0_16] : memref<1x24x18xf32, #tpu.memory_space<vmem>>, vector<1x1x6xf32>
    %17 = vector.shape_cast %16 : vector<1x1x6xf32> to vector<1x6xf32>
    %c0_17 = arith.constant 0 : index
    %c21 = arith.constant 21 : index
    %c0_18 = arith.constant 0 : index
    %18 = vector.load %arg2[%c0_17, %c21, %c0_18] : memref<1x24x18xf32, #tpu.memory_space<vmem>>, vector<1x1x6xf32>
    %19 = vector.shape_cast %18 : vector<1x1x6xf32> to vector<1x6xf32>
    %c0_19 = arith.constant 0 : index
    %c22 = arith.constant 22 : index
    %c0_20 = arith.constant 0 : index
    %20 = vector.load %arg2[%c0_19, %c22, %c0_20] : memref<1x24x18xf32, #tpu.memory_space<vmem>>, vector<1x1x6xf32>
    %21 = vector.shape_cast %20 : vector<1x1x6xf32> to vector<1x6xf32>
    %cst = arith.constant dense<0.000000e+00> : vector<16x18xf32>
    %22 = tpu.matmul %3, %5, %cst {dimension_numbers = #tpu.dot_dimension_numbers<[1], [0], [0], [1], [0, 0, 1, 1], [], []>} : vector<16x6xf32>, vector<6x18xf32>, vector<16x18xf32> -> vector<16x18xf32>
    %23 = vector.broadcast %9 : vector<1x18xf32> to vector<16x18xf32>
    %24 = arith.addf %22, %23 : vector<16x18xf32>
    %25 = vector.extract_strided_slice %24 {offsets = [0, 0], sizes = [16, 6], strides = [1, 1]} : vector<16x18xf32> to vector<16x6xf32>
    %26 = vector.extract_strided_slice %24 {offsets = [0, 6], sizes = [16, 6], strides = [1, 1]} : vector<16x18xf32> to vector<16x6xf32>
    %27 = vector.extract_strided_slice %24 {offsets = [0, 12], sizes = [16, 6], strides = [1, 1]} : vector<16x18xf32> to vector<16x6xf32>
    %28 = vector.extract_strided_slice %25 {offsets = [0, 0], sizes = [8, 6], strides = [1, 1]} : vector<16x6xf32> to vector<8x6xf32>
    %29 = vector.extract_strided_slice %26 {offsets = [0, 0], sizes = [8, 6], strides = [1, 1]} : vector<16x6xf32> to vector<8x6xf32>
    %30 = arith.mulf %28, %29 : vector<8x6xf32>
    %31 = vector.extract_strided_slice %26 {offsets = [8, 0], sizes = [8, 6], strides = [1, 1]} : vector<16x6xf32> to vector<8x6xf32>
    %32 = arith.mulf %28, %31 : vector<8x6xf32>
    %33 = arith.maximumf %30, %32 : vector<8x6xf32>
    %cst_21 = arith.constant 0.000000e+00 : f32
    %34 = vector.broadcast %cst_21 : f32 to vector<8x6xf32>
    %cst_22 = arith.constant 0.000000e+00 : f32
    %35 = vector.broadcast %cst_22 : f32 to vector<8x6xf32>
    %36 = arith.subf %30, %33 : vector<8x6xf32>
    %37 = math.exp %36 : vector<8x6xf32>
    %38 = arith.addf %35, %37 : vector<8x6xf32>
    %39 = vector.extract_strided_slice %27 {offsets = [0, 0], sizes = [8, 6], strides = [1, 1]} : vector<16x6xf32> to vector<8x6xf32>
    %40 = arith.mulf %37, %39 : vector<8x6xf32>
    %41 = arith.addf %34, %40 : vector<8x6xf32>
    %42 = arith.subf %32, %33 : vector<8x6xf32>
    %43 = math.exp %42 : vector<8x6xf32>
    %44 = arith.addf %38, %43 : vector<8x6xf32>
    %45 = vector.extract_strided_slice %27 {offsets = [8, 0], sizes = [8, 6], strides = [1, 1]} : vector<16x6xf32> to vector<8x6xf32>
    %46 = arith.mulf %43, %45 : vector<8x6xf32>
    %47 = arith.addf %41, %46 : vector<8x6xf32>
    %48 = arith.divf %47, %44 : vector<8x6xf32>
    %c0_23 = arith.constant 0 : index
    %c0_24 = arith.constant 0 : index
    %49 = vector.load %arg8[%c0_23, %c0_24] : memref<16x6xf32, #tpu.memory_space<vmem>>, vector<8x6xf32>
    tpu.vector_store %arg8[%c0_23, %c0_24], %48 {strides = array<i32>} : memref<16x6xf32, #tpu.memory_space<vmem>>, vector<8x6xf32>,
    %50 = vector.extract_strided_slice %25 {offsets = [8, 0], sizes = [8, 6], strides = [1, 1]} : vector<16x6xf32> to vector<8x6xf32>
    %51 = vector.extract_strided_slice %26 {offsets = [0, 0], sizes = [8, 6], strides = [1, 1]} : vector<16x6xf32> to vector<8x6xf32>
    %52 = arith.mulf %50, %51 : vector<8x6xf32>
    %53 = vector.extract_strided_slice %26 {offsets = [8, 0], sizes = [8, 6], strides = [1, 1]} : vector<16x6xf32> to vector<8x6xf32>
    %54 = arith.mulf %50, %53 : vector<8x6xf32>
    %55 = arith.maximumf %52, %54 : vector<8x6xf32>
    %cst_25 = arith.constant 0.000000e+00 : f32
    %56 = vector.broadcast %cst_25 : f32 to vector<8x6xf32>
    %cst_26 = arith.constant 0.000000e+00 : f32
    %57 = vector.broadcast %cst_26 : f32 to vector<8x6xf32>
    %58 = arith.subf %52, %55 : vector<8x6xf32>
    %59 = math.exp %58 : vector<8x6xf32>
    %60 = arith.addf %57, %59 : vector<8x6xf32>
    %61 = vector.extract_strided_slice %27 {offsets = [0, 0], sizes = [8, 6], strides = [1, 1]} : vector<16x6xf32> to vector<8x6xf32>
    %62 = arith.mulf %59, %61 : vector<8x6xf32>
    %63 = arith.addf %56, %62 : vector<8x6xf32>
    %64 = arith.subf %54, %55 : vector<8x6xf32>
    %65 = math.exp %64 : vector<8x6xf32>
    %66 = arith.addf %60, %65 : vector<8x6xf32>
    %67 = vector.extract_strided_slice %27 {offsets = [8, 0], sizes = [8, 6], strides = [1, 1]} : vector<16x6xf32> to vector<8x6xf32>
    %68 = arith.mulf %65, %67 : vector<8x6xf32>
    %69 = arith.addf %63, %68 : vector<8x6xf32>
    %70 = arith.divf %69, %66 : vector<8x6xf32>
    %c8_27 = arith.constant 8 : index
    %c0_28 = arith.constant 0 : index
    %71 = vector.load %arg8[%c8_27, %c0_28] : memref<16x6xf32, #tpu.memory_space<vmem>>, vector<8x6xf32>
    tpu.vector_store %arg8[%c8_27, %c0_28], %70 {strides = array<i32>} : memref<16x6xf32, #tpu.memory_space<vmem>>, vector<8x6xf32>,
    %c0_29 = arith.constant 0 : index
    %c0_30 = arith.constant 0 : index
    %72 = vector.load %arg8[%c0_29, %c0_30] : memref<16x6xf32, #tpu.memory_space<vmem>>, vector<16x6xf32>
    %cst_31 = arith.constant dense<0.000000e+00> : vector<16x6xf32>
    %73 = tpu.matmul %72, %7, %cst_31 {dimension_numbers = #tpu.dot_dimension_numbers<[1], [0], [0], [1], [0, 0, 1, 1], [], []>} : vector<16x6xf32>, vector<6x6xf32>, vector<16x6xf32> -> vector<16x6xf32>
    %74 = vector.broadcast %11 : vector<1x6xf32> to vector<16x6xf32>
    %75 = arith.addf %73, %74 : vector<16x6xf32>
    %76 = arith.addf %3, %75 : vector<16x6xf32>
    %cst_32 = arith.constant dense<0.000000e+00> : vector<16xf32>
    %77 = vector.multi_reduction <add>, %76, %cst_32 [1] : vector<16x6xf32> to vector<16xf32>
    %78 = vector.shape_cast %77 : vector<16xf32> to vector<16x1xf32>
    %cst_33 = arith.constant 6.000000e+00 : f32
    %79 = vector.broadcast %cst_33 : f32 to vector<16x1xf32>
    %80 = arith.divf %78, %79 : vector<16x1xf32>
    %81 = vector.broadcast %80 : vector<16x1xf32> to vector<16x6xf32>
    %82 = arith.subf %76, %81 : vector<16x6xf32>
    %83 = arith.mulf %82, %82 : vector<16x6xf32>
    %cst_34 = arith.constant dense<0.000000e+00> : vector<16xf32>
    %84 = vector.multi_reduction <add>, %83, %cst_34 [1] : vector<16x6xf32> to vector<16xf32>
    %85 = vector.shape_cast %84 : vector<16xf32> to vector<16x1xf32>
    %cst_35 = arith.constant 6.000000e+00 : f32
    %86 = vector.broadcast %cst_35 : f32 to vector<16x1xf32>
    %87 = arith.divf %85, %86 : vector<16x1xf32>
    %cst_36 = arith.constant 9.99999974E-6 : f32
    %88 = vector.broadcast %cst_36 : f32 to vector<16x1xf32>
    %89 = arith.addf %87, %88 : vector<16x1xf32>
    %90 = math.rsqrt %89 : vector<16x1xf32>
    %91 = vector.broadcast %90 : vector<16x1xf32> to vector<16x6xf32>
    %92 = arith.mulf %82, %91 : vector<16x6xf32>
    %93 = vector.broadcast %13 : vector<1x6xf32> to vector<16x6xf32>
    %94 = arith.mulf %92, %93 : vector<16x6xf32>
    %95 = vector.broadcast %15 : vector<1x6xf32> to vector<16x6xf32>
    %96 = arith.addf %94, %95 : vector<16x6xf32>
    %c0_37 = arith.constant 0 : index
    %c0_38 = arith.constant 0 : index
    %c0_39 = arith.constant 0 : index
    %97 = vector.load %arg3[%c0_37, %c0_38, %c0_39] : memref<1x7x2048xf32, #tpu.memory_space<vmem>>, vector<1x6x2048xf32>
    %98 = vector.shape_cast %97 : vector<1x6x2048xf32> to vector<6x2048xf32>
    %c0_40 = arith.constant 0 : index
    %c6 = arith.constant 6 : index
    %c0_41 = arith.constant 0 : index
    %99 = vector.load %arg3[%c0_40, %c6, %c0_41] : memref<1x7x2048xf32, #tpu.memory_space<vmem>>, vector<1x1x2048xf32>
    %100 = vector.shape_cast %99 : vector<1x1x2048xf32> to vector<1x2048xf32>
    %cst_42 = arith.constant dense<0.000000e+00> : vector<16x2048xf32>
    %101 = tpu.matmul %96, %98, %cst_42 {dimension_numbers = #tpu.dot_dimension_numbers<[1], [0], [0], [1], [0, 0, 1, 1], [], []>} : vector<16x6xf32>, vector<6x2048xf32>, vector<16x2048xf32> -> vector<16x2048xf32>
    %102 = vector.broadcast %100 : vector<1x2048xf32> to vector<16x2048xf32>
    %103 = arith.addf %101, %102 : vector<16x2048xf32>
    %cst_43 = arith.constant 0.000000e+00 : f32
    %104 = vector.broadcast %cst_43 : f32 to vector<16x2048xf32>
    %105 = arith.maximumf %103, %104 : vector<16x2048xf32>
    %c0_44 = arith.constant 0 : index
    %c0_45 = arith.constant 0 : index
    %c0_46 = arith.constant 0 : index
    %106 = vector.load %arg4[%c0_44, %c0_45, %c0_46] : memref<1x6x2048xf32, #tpu.memory_space<vmem>>, vector<1x6x2048xf32>
    %107 = vector.shape_cast %106 : vector<1x6x2048xf32> to vector<6x2048xf32>
    %cst_47 = arith.constant dense<0.000000e+00> : vector<16x6xf32>
    %108 = tpu.matmul %105, %107, %cst_47 {dimension_numbers = #tpu.dot_dimension_numbers<[1], [1], [0], [0], [0, 0, 1, 0], [], []>} : vector<16x2048xf32>, vector<6x2048xf32>, vector<16x6xf32> -> vector<16x6xf32>
    %109 = vector.broadcast %21 : vector<1x6xf32> to vector<16x6xf32>
    %110 = arith.addf %108, %109 : vector<16x6xf32>
    %111 = arith.addf %96, %110 : vector<16x6xf32>
    %cst_48 = arith.constant dense<0.000000e+00> : vector<16xf32>
    %112 = vector.multi_reduction <add>, %111, %cst_48 [1] : vector<16x6xf32> to vector<16xf32>
    %113 = vector.shape_cast %112 : vector<16xf32> to vector<16x1xf32>
    %cst_49 = arith.constant 6.000000e+00 : f32
    %114 = vector.broadcast %cst_49 : f32 to vector<16x1xf32>
    %115 = arith.divf %113, %114 : vector<16x1xf32>
    %116 = vector.broadcast %115 : vector<16x1xf32> to vector<16x6xf32>
    %117 = arith.subf %111, %116 : vector<16x6xf32>
    %118 = arith.mulf %117, %117 : vector<16x6xf32>
    %cst_50 = arith.constant dense<0.000000e+00> : vector<16xf32>
    %119 = vector.multi_reduction <add>, %118, %cst_50 [1] : vector<16x6xf32> to vector<16xf32>
    %120 = vector.shape_cast %119 : vector<16xf32> to vector<16x1xf32>
    %cst_51 = arith.constant 6.000000e+00 : f32
    %121 = vector.broadcast %cst_51 : f32 to vector<16x1xf32>
    %122 = arith.divf %120, %121 : vector<16x1xf32>
    %cst_52 = arith.constant 9.99999974E-6 : f32
    %123 = vector.broadcast %cst_52 : f32 to vector<16x1xf32>
    %124 = arith.addf %122, %123 : vector<16x1xf32>
    %125 = math.rsqrt %124 : vector<16x1xf32>
    %126 = vector.broadcast %125 : vector<16x1xf32> to vector<16x6xf32>
    %127 = arith.mulf %117, %126 : vector<16x6xf32>
    %128 = vector.broadcast %17 : vector<1x6xf32> to vector<16x6xf32>
    %129 = arith.mulf %127, %128 : vector<16x6xf32>
    %130 = vector.broadcast %19 : vector<1x6xf32> to vector<16x6xf32>
    %131 = arith.addf %129, %130 : vector<16x6xf32>
    %c0_53 = arith.constant 0 : index
    %c0_54 = arith.constant 0 : index
    %132 = vector.load %arg7[%c0_53, %c0_54] : memref<16x6xf32, #tpu.memory_space<vmem>>, vector<16x6xf32>
    tpu.vector_store %arg7[%c0_53, %c0_54], %131 {strides = array<i32>} : memref<16x6xf32, #tpu.memory_space<vmem>>, vector<16x6xf32>,
    %c1_i32 = arith.constant 1 : i32
    %133 = arith.cmpi eq, %arg0, %c1_i32 : i32
    %134 = arith.extui %133 : i1 to i32
    %c0_i32_55 = arith.constant 0 : i32
    %135 = arith.cmpi ne, %134, %c0_i32_55 : i32
    scf.if %135 {
      %136 = vector.extract_strided_slice %131 {offsets = [0, 0], sizes = [8, 6], strides = [1, 1]} : vector<16x6xf32> to vector<8x6xf32>
      %c48 = arith.constant 48 : index
      %c0_56 = arith.constant 0 : index
      %137 = vector.load %arg5[%c48, %c0_56] : memref<49x3xf32, #tpu.memory_space<vmem>>, vector<1x3xf32>
      %138 = vector.extract_strided_slice %136 {offsets = [0, 0], sizes = [1, 6], strides = [1, 1]} : vector<8x6xf32> to vector<1x6xf32>
      %c0_57 = arith.constant 0 : index
      %c0_58 = arith.constant 0 : index
      %139 = vector.load %arg5[%c0_57, %c0_58] : memref<49x3xf32, #tpu.memory_space<vmem>>, vector<6x3xf32>
      %cst_59 = arith.constant dense<0.000000e+00> : vector<1x3xf32>
      %140 = tpu.matmul %138, %139, %cst_59 {dimension_numbers = #tpu.dot_dimension_numbers<[1], [0], [0], [1], [0, 0, 1, 1], [], []>} : vector<1x6xf32>, vector<6x3xf32>, vector<1x3xf32> -> vector<1x3xf32>
      %141 = arith.addf %137, %140 : vector<1x3xf32>
      %142 = vector.extract_strided_slice %136 {offsets = [1, 0], sizes = [1, 6], strides = [1, 1]} : vector<8x6xf32> to vector<1x6xf32>
      %c6_60 = arith.constant 6 : index
      %c0_61 = arith.constant 0 : index
      %143 = vector.load %arg5[%c6_60, %c0_61] : memref<49x3xf32, #tpu.memory_space<vmem>>, vector<6x3xf32>
      %cst_62 = arith.constant dense<0.000000e+00> : vector<1x3xf32>
      %144 = tpu.matmul %142, %143, %cst_62 {dimension_numbers = #tpu.dot_dimension_numbers<[1], [0], [0], [1], [0, 0, 1, 1], [], []>} : vector<1x6xf32>, vector<6x3xf32>, vector<1x3xf32> -> vector<1x3xf32>
      %145 = arith.addf %141, %144 : vector<1x3xf32>
      %146 = vector.extract_strided_slice %136 {offsets = [2, 0], sizes = [1, 6], strides = [1, 1]} : vector<8x6xf32> to vector<1x6xf32>
      %c12 = arith.constant 12 : index
      %c0_63 = arith.constant 0 : index
      %147 = vector.load %arg5[%c12, %c0_63] : memref<49x3xf32, #tpu.memory_space<vmem>>, vector<6x3xf32>
      %cst_64 = arith.constant dense<0.000000e+00> : vector<1x3xf32>
      %148 = tpu.matmul %146, %147, %cst_64 {dimension_numbers = #tpu.dot_dimension_numbers<[1], [0], [0], [1], [0, 0, 1, 1], [], []>} : vector<1x6xf32>, vector<6x3xf32>, vector<1x3xf32> -> vector<1x3xf32>
      %149 = arith.addf %145, %148 : vector<1x3xf32>
      %150 = vector.extract_strided_slice %136 {offsets = [3, 0], sizes = [1, 6], strides = [1, 1]} : vector<8x6xf32> to vector<1x6xf32>
      %c18_65 = arith.constant 18 : index
      %c0_66 = arith.constant 0 : index
      %151 = vector.load %arg5[%c18_65, %c0_66] : memref<49x3xf32, #tpu.memory_space<vmem>>, vector<6x3xf32>
      %cst_67 = arith.constant dense<0.000000e+00> : vector<1x3xf32>
      %152 = tpu.matmul %150, %151, %cst_67 {dimension_numbers = #tpu.dot_dimension_numbers<[1], [0], [0], [1], [0, 0, 1, 1], [], []>} : vector<1x6xf32>, vector<6x3xf32>, vector<1x3xf32> -> vector<1x3xf32>
      %153 = arith.addf %149, %152 : vector<1x3xf32>
      %154 = vector.extract_strided_slice %136 {offsets = [4, 0], sizes = [1, 6], strides = [1, 1]} : vector<8x6xf32> to vector<1x6xf32>
      %c24 = arith.constant 24 : index
      %c0_68 = arith.constant 0 : index
      %155 = vector.load %arg5[%c24, %c0_68] : memref<49x3xf32, #tpu.memory_space<vmem>>, vector<6x3xf32>
      %cst_69 = arith.constant dense<0.000000e+00> : vector<1x3xf32>
      %156 = tpu.matmul %154, %155, %cst_69 {dimension_numbers = #tpu.dot_dimension_numbers<[1], [0], [0], [1], [0, 0, 1, 1], [], []>} : vector<1x6xf32>, vector<6x3xf32>, vector<1x3xf32> -> vector<1x3xf32>
      %157 = arith.addf %153, %156 : vector<1x3xf32>
      %158 = vector.extract_strided_slice %136 {offsets = [5, 0], sizes = [1, 6], strides = [1, 1]} : vector<8x6xf32> to vector<1x6xf32>
      %c30 = arith.constant 30 : index
      %c0_70 = arith.constant 0 : index
      %159 = vector.load %arg5[%c30, %c0_70] : memref<49x3xf32, #tpu.memory_space<vmem>>, vector<6x3xf32>
      %cst_71 = arith.constant dense<0.000000e+00> : vector<1x3xf32>
      %160 = tpu.matmul %158, %159, %cst_71 {dimension_numbers = #tpu.dot_dimension_numbers<[1], [0], [0], [1], [0, 0, 1, 1], [], []>} : vector<1x6xf32>, vector<6x3xf32>, vector<1x3xf32> -> vector<1x3xf32>
      %161 = arith.addf %157, %160 : vector<1x3xf32>
      %162 = vector.extract_strided_slice %136 {offsets = [6, 0], sizes = [1, 6], strides = [1, 1]} : vector<8x6xf32> to vector<1x6xf32>
      %c36 = arith.constant 36 : index
      %c0_72 = arith.constant 0 : index
      %163 = vector.load %arg5[%c36, %c0_72] : memref<49x3xf32, #tpu.memory_space<vmem>>, vector<6x3xf32>
      %cst_73 = arith.constant dense<0.000000e+00> : vector<1x3xf32>
      %164 = tpu.matmul %162, %163, %cst_73 {dimension_numbers = #tpu.dot_dimension_numbers<[1], [0], [0], [1], [0, 0, 1, 1], [], []>} : vector<1x6xf32>, vector<6x3xf32>, vector<1x3xf32> -> vector<1x3xf32>
      %165 = arith.addf %161, %164 : vector<1x3xf32>
      %166 = vector.extract_strided_slice %136 {offsets = [7, 0], sizes = [1, 6], strides = [1, 1]} : vector<8x6xf32> to vector<1x6xf32>
      %c42 = arith.constant 42 : index
      %c0_74 = arith.constant 0 : index
      %167 = vector.load %arg5[%c42, %c0_74] : memref<49x3xf32, #tpu.memory_space<vmem>>, vector<6x3xf32>
      %cst_75 = arith.constant dense<0.000000e+00> : vector<1x3xf32>
      %168 = tpu.matmul %166, %167, %cst_75 {dimension_numbers = #tpu.dot_dimension_numbers<[1], [0], [0], [1], [0, 0, 1, 1], [], []>} : vector<1x6xf32>, vector<6x3xf32>, vector<1x3xf32> -> vector<1x3xf32>
      %169 = arith.addf %165, %168 : vector<1x3xf32>
      %cst_76 = arith.constant dense<0xFF800000> : vector<1xf32>
      %170 = vector.multi_reduction <maximumf>, %169, %cst_76 [1] : vector<1x3xf32> to vector<1xf32>
      %171 = vector.shape_cast %170 : vector<1xf32> to vector<1x1xf32>
      %172 = vector.broadcast %171 : vector<1x1xf32> to vector<1x3xf32>
      %173 = arith.subf %169, %172 : vector<1x3xf32>
      %174 = math.exp %173 : vector<1x3xf32>
      %cst_77 = arith.constant dense<0.000000e+00> : vector<1xf32>
      %175 = vector.multi_reduction <add>, %174, %cst_77 [1] : vector<1x3xf32> to vector<1xf32>
      %176 = vector.shape_cast %175 : vector<1xf32> to vector<1x1xf32>
      %177 = vector.broadcast %176 : vector<1x1xf32> to vector<1x3xf32>
      %178 = arith.divf %174, %177 : vector<1x3xf32>
      %c0_78 = arith.constant 0 : index
      %c0_79 = arith.constant 0 : index
      %179 = vector.load %arg6[%c0_78, %c0_79] : memref<2x3xf32, #tpu.memory_space<vmem>>, vector<1x3xf32>
      tpu.vector_store %arg6[%c0_78, %c0_79], %178 {strides = array<i32>} : memref<2x3xf32, #tpu.memory_space<vmem>>, vector<1x3xf32>,
      %180 = vector.extract_strided_slice %131 {offsets = [8, 0], sizes = [8, 6], strides = [1, 1]} : vector<16x6xf32> to vector<8x6xf32>
      %c48_80 = arith.constant 48 : index
      %c0_81 = arith.constant 0 : index
      %181 = vector.load %arg5[%c48_80, %c0_81] : memref<49x3xf32, #tpu.memory_space<vmem>>, vector<1x3xf32>
      %182 = vector.extract_strided_slice %180 {offsets = [0, 0], sizes = [1, 6], strides = [1, 1]} : vector<8x6xf32> to vector<1x6xf32>
      %c0_82 = arith.constant 0 : index
      %c0_83 = arith.constant 0 : index
      %183 = vector.load %arg5[%c0_82, %c0_83] : memref<49x3xf32, #tpu.memory_space<vmem>>, vector<6x3xf32>
      %cst_84 = arith.constant dense<0.000000e+00> : vector<1x3xf32>
      %184 = tpu.matmul %182, %183, %cst_84 {dimension_numbers = #tpu.dot_dimension_numbers<[1], [0], [0], [1], [0, 0, 1, 1], [], []>} : vector<1x6xf32>, vector<6x3xf32>, vector<1x3xf32> -> vector<1x3xf32>
      %185 = arith.addf %181, %184 : vector<1x3xf32>
      %186 = vector.extract_strided_slice %180 {offsets = [1, 0], sizes = [1, 6], strides = [1, 1]} : vector<8x6xf32> to vector<1x6xf32>
      %c6_85 = arith.constant 6 : index
      %c0_86 = arith.constant 0 : index
      %187 = vector.load %arg5[%c6_85, %c0_86] : memref<49x3xf32, #tpu.memory_space<vmem>>, vector<6x3xf32>
      %cst_87 = arith.constant dense<0.000000e+00> : vector<1x3xf32>
      %188 = tpu.matmul %186, %187, %cst_87 {dimension_numbers = #tpu.dot_dimension_numbers<[1], [0], [0], [1], [0, 0, 1, 1], [], []>} : vector<1x6xf32>, vector<6x3xf32>, vector<1x3xf32> -> vector<1x3xf32>
      %189 = arith.addf %185, %188 : vector<1x3xf32>
      %190 = vector.extract_strided_slice %180 {offsets = [2, 0], sizes = [1, 6], strides = [1, 1]} : vector<8x6xf32> to vector<1x6xf32>
      %c12_88 = arith.constant 12 : index
      %c0_89 = arith.constant 0 : index
      %191 = vector.load %arg5[%c12_88, %c0_89] : memref<49x3xf32, #tpu.memory_space<vmem>>, vector<6x3xf32>
      %cst_90 = arith.constant dense<0.000000e+00> : vector<1x3xf32>
      %192 = tpu.matmul %190, %191, %cst_90 {dimension_numbers = #tpu.dot_dimension_numbers<[1], [0], [0], [1], [0, 0, 1, 1], [], []>} : vector<1x6xf32>, vector<6x3xf32>, vector<1x3xf32> -> vector<1x3xf32>
      %193 = arith.addf %189, %192 : vector<1x3xf32>
      %194 = vector.extract_strided_slice %180 {offsets = [3, 0], sizes = [1, 6], strides = [1, 1]} : vector<8x6xf32> to vector<1x6xf32>
      %c18_91 = arith.constant 18 : index
      %c0_92 = arith.constant 0 : index
      %195 = vector.load %arg5[%c18_91, %c0_92] : memref<49x3xf32, #tpu.memory_space<vmem>>, vector<6x3xf32>
      %cst_93 = arith.constant dense<0.000000e+00> : vector<1x3xf32>
      %196 = tpu.matmul %194, %195, %cst_93 {dimension_numbers = #tpu.dot_dimension_numbers<[1], [0], [0], [1], [0, 0, 1, 1], [], []>} : vector<1x6xf32>, vector<6x3xf32>, vector<1x3xf32> -> vector<1x3xf32>
      %197 = arith.addf %193, %196 : vector<1x3xf32>
      %198 = vector.extract_strided_slice %180 {offsets = [4, 0], sizes = [1, 6], strides = [1, 1]} : vector<8x6xf32> to vector<1x6xf32>
      %c24_94 = arith.constant 24 : index
      %c0_95 = arith.constant 0 : index
      %199 = vector.load %arg5[%c24_94, %c0_95] : memref<49x3xf32, #tpu.memory_space<vmem>>, vector<6x3xf32>
      %cst_96 = arith.constant dense<0.000000e+00> : vector<1x3xf32>
      %200 = tpu.matmul %198, %199, %cst_96 {dimension_numbers = #tpu.dot_dimension_numbers<[1], [0], [0], [1], [0, 0, 1, 1], [], []>} : vector<1x6xf32>, vector<6x3xf32>, vector<1x3xf32> -> vector<1x3xf32>
      %201 = arith.addf %197, %200 : vector<1x3xf32>
      %202 = vector.extract_strided_slice %180 {offsets = [5, 0], sizes = [1, 6], strides = [1, 1]} : vector<8x6xf32> to vector<1x6xf32>
      %c30_97 = arith.constant 30 : index
      %c0_98 = arith.constant 0 : index
      %203 = vector.load %arg5[%c30_97, %c0_98] : memref<49x3xf32, #tpu.memory_space<vmem>>, vector<6x3xf32>
      %cst_99 = arith.constant dense<0.000000e+00> : vector<1x3xf32>
      %204 = tpu.matmul %202, %203, %cst_99 {dimension_numbers = #tpu.dot_dimension_numbers<[1], [0], [0], [1], [0, 0, 1, 1], [], []>} : vector<1x6xf32>, vector<6x3xf32>, vector<1x3xf32> -> vector<1x3xf32>
      %205 = arith.addf %201, %204 : vector<1x3xf32>
      %206 = vector.extract_strided_slice %180 {offsets = [6, 0], sizes = [1, 6], strides = [1, 1]} : vector<8x6xf32> to vector<1x6xf32>
      %c36_100 = arith.constant 36 : index
      %c0_101 = arith.constant 0 : index
      %207 = vector.load %arg5[%c36_100, %c0_101] : memref<49x3xf32, #tpu.memory_space<vmem>>, vector<6x3xf32>
      %cst_102 = arith.constant dense<0.000000e+00> : vector<1x3xf32>
      %208 = tpu.matmul %206, %207, %cst_102 {dimension_numbers = #tpu.dot_dimension_numbers<[1], [0], [0], [1], [0, 0, 1, 1], [], []>} : vector<1x6xf32>, vector<6x3xf32>, vector<1x3xf32> -> vector<1x3xf32>
      %209 = arith.addf %205, %208 : vector<1x3xf32>
      %210 = vector.extract_strided_slice %180 {offsets = [7, 0], sizes = [1, 6], strides = [1, 1]} : vector<8x6xf32> to vector<1x6xf32>
      %c42_103 = arith.constant 42 : index
      %c0_104 = arith.constant 0 : index
      %211 = vector.load %arg5[%c42_103, %c0_104] : memref<49x3xf32, #tpu.memory_space<vmem>>, vector<6x3xf32>
      %cst_105 = arith.constant dense<0.000000e+00> : vector<1x3xf32>
      %212 = tpu.matmul %210, %211, %cst_105 {dimension_numbers = #tpu.dot_dimension_numbers<[1], [0], [0], [1], [0, 0, 1, 1], [], []>} : vector<1x6xf32>, vector<6x3xf32>, vector<1x3xf32> -> vector<1x3xf32>
      %213 = arith.addf %209, %212 : vector<1x3xf32>
      %cst_106 = arith.constant dense<0xFF800000> : vector<1xf32>
      %214 = vector.multi_reduction <maximumf>, %213, %cst_106 [1] : vector<1x3xf32> to vector<1xf32>
      %215 = vector.shape_cast %214 : vector<1xf32> to vector<1x1xf32>
      %216 = vector.broadcast %215 : vector<1x1xf32> to vector<1x3xf32>
      %217 = arith.subf %213, %216 : vector<1x3xf32>
      %218 = math.exp %217 : vector<1x3xf32>
      %cst_107 = arith.constant dense<0.000000e+00> : vector<1xf32>
      %219 = vector.multi_reduction <add>, %218, %cst_107 [1] : vector<1x3xf32> to vector<1xf32>
      %220 = vector.shape_cast %219 : vector<1xf32> to vector<1x1xf32>
      %221 = vector.broadcast %220 : vector<1x1xf32> to vector<1x3xf32>
      %222 = arith.divf %218, %221 : vector<1x3xf32>
      %c1 = arith.constant 1 : index
      %c0_108 = arith.constant 0 : index
      %223 = vector.load %arg6[%c1, %c0_108] : memref<2x3xf32, #tpu.memory_space<vmem>>, vector<1x3xf32>
      tpu.vector_store %arg6[%c1, %c0_108], %222 {strides = array<i32>} : memref<2x3xf32, #tpu.memory_space<vmem>>, vector<1x3xf32>,
    } else {
    }
    return
  }
  func.func @transform_0(%arg0: i32) -> (i32, i32) {
    %c0_i32 = arith.constant 0 : i32
    %c0_i32_0 = arith.constant 0 : i32
    %c0_i32_1 = arith.constant 0 : i32
    return %c0_i32, %c0_i32_0 : i32, i32
  }
  func.func @transform_1(%arg0: i32) -> (i32, i32, i32) {
    %c0_i32 = arith.constant 0 : i32
    %c0_i32_0 = arith.constant 0 : i32
    %c0_i32_1 = arith.constant 0 : i32
    return %arg0, %c0_i32, %c0_i32_0 : i32, i32, i32
  }
  func.func @transform_2(%arg0: i32) -> (i32, i32, i32) {
    %c0_i32 = arith.constant 0 : i32
    %c0_i32_0 = arith.constant 0 : i32
    %c0_i32_1 = arith.constant 0 : i32
    return %arg0, %c0_i32, %c0_i32_0 : i32, i32, i32
  }
  func.func @transform_3(%arg0: i32) -> (i32, i32, i32) {
    %c0_i32 = arith.constant 0 : i32
    %c0_i32_0 = arith.constant 0 : i32
    %c0_i32_1 = arith.constant 0 : i32
    return %arg0, %c0_i32, %c0_i32_0 : i32, i32, i32
  }
  func.func @transform_4(%arg0: i32) -> (i32, i32) {
    %c0_i32 = arith.constant 0 : i32
    %c0_i32_0 = arith.constant 0 : i32
    %c0_i32_1 = arith.constant 0 : i32
    return %c0_i32, %c0_i32_0 : i32, i32
  }
  func.func @transform_5(%arg0: i32) -> (i32, i32) {
    %c0_i32 = arith.constant 0 : i32
    %c0_i32_0 = arith.constant 0 : i32
    %c0_i32_1 = arith.constant 0 : i32
    return %c0_i32, %c0_i32_0 : i32, i32
  }
}

</mosaic_0001>

<bundles_post_ra>
// kernel: tpu_custom_call.1
= control target key start
LH: loop header
LB: loop body
LE: loop exit
PB: predicated region body
PF: predicated region fallthrough
CT: control target
= control target key end

     0   :  { %10 = vsyncpa [#allocation5], 0  ;;  %s3708_s18 = smov 0   ;;  %s4104_s0 = inlined_call_operand.vmem [shape: f32[16,6], index: 0, kind: input, shape index: {}]   ;;  %s4105_s1 = inlined_call_operand.vmem [shape: f32[2,24,18], index: 1, kind: input, shape index: {}]   ;;  %s4106_s2 = inlined_call_operand.vmem [shape: f32[2,7,2048], index: 2, kind: input, shape index: {}]   ;;  %s4107_s3 = inlined_call_operand.vmem [shape: f32[2,6,2048], index: 3, kind: input, shape index: {}]   ;;  %s4108_s4 = inlined_call_operand.vmem [shape: f32[49,3], index: 4, kind: input, shape index: {}]   ;;  %s4109_s5 = inlined_call_operand.hbm [shape: f32[2,3], index: 5, kind: output, shape index: {}]  }
   0x1 LB: > { %s3714_s19 = sadd.s32 4294967295, %s3670_s18   ;;  %p3364_p0 = scmp.ge.s32.totalorder %s3670_s18, 1  ;;  %s3670_s18 = sphi %s3708_s18, %s16_s18  }
   0x2   : > { %p203_p1 = scmp.lt.s32.totalorder %s3670_s18, 3 }
   0x4   : > { %p204_p2 = pnand %p3364_p0, %p203_p1 }
   0x5   : > { %p236_p3 = scmp.lt.s32.totalorder (!%p204_p2), %s3714_s19, 1  ;;  %p3370_p4 = scmp.ne.s32.totalorder (!%p204_p2), %s3714_s19, 0 }
   0x6   : > { %207 = sbr.rel (%p204_p2) target bundleno = 2193 (0x891), region = 40 }
   0xb   : > { %s237_s20 = scalar_select %p236_p3, %s3714_s19, 1 }
   0xc   : > { %254 = sbr.rel (%p3370_p4) target bundleno = 19 (0x13), region = 44 }
   0xd   : > { %s3587_s21 = smul.u32 24, %s237_s20  ;;  %s3457_s22 = sshll.u32 %s237_s20, 7 }
   0xe   : > { %s3723_s25 = scalar_lea.vmem %s4106_s2, %s3457_s22  ;;  %s3728_s28 = scalar_lea.vmem %s4107_s3, %s3457_s22 }
   0xf   : > { %s3733_s6 = scalar_lea.vmem %s4105_s1, %s3587_s21 }
  0x11   : > { %v255_v0 = vld [vmem:[%s4104_s0] sm:$0xff]  ;;  %vm257_vm0 = vcmask 48128   ;;  %v256_v1 = vld [vmem:[%s4104_s0 + $0x8] sm:$0xff] }
  0x12   : > { %258 = vst.msk [vmem:[#allocation2] sm:$0xff] %vm257_vm0, %v255_v0  ;;  %259 = vst.msk [vmem:[#allocation2 + $0x8] sm:$0xff] %vm257_vm0, %v256_v1 }
  0x13 PF: > { %v262_v2 = vld [vmem:[%s3733_s6] sm:$0x3f]  ;;  %vm282_vm1 = vcmask 1045504   ;;  %vm275_vm2 = vcmask 48128   ;;  %v3371_v6 = vld [vmem:[%s3733_s6 + $0x10] ss:$0 sm:$0xff] }
  0x14   : > { %3497 = vmatprep.subr.msk.mxu0 %vm282_vm1, %v262_v2  ;;  %s3672_s11 = smov 116   ;;  %s3673_s12 = smov 122   ;;  %v263_v10 = vld [vmem:[%s3733_s6 + $0x8] sm:$0x3f]  ;;  %v3375_v47 = vld [vmem:[%s3733_s6 + $0x11] ss:$0 sm:$0xff] }
  0x15   : > { %3498 = vmatpush3.msk.msra.mxu0 %vm282_vm1, %v262_v2  ;;  %3502 = vmatprep.subr.msk.mxu1 %vm282_vm1, %v263_v10  ;;  %v543_v2 = vld [vmem:[%s3723_s25 + $0x8] sm:$0x3f]  ;;  %p3420_p5 = scmp.ne.s32.totalorder %s3714_s19, 1 }
  0x16   : > { %3503 = vmatpush3.msk.msra.mxu1 %vm282_vm1, %v263_v10  ;;  %3385 = vmatprep.subr.msk.mxu0 %vm282_vm1, %v543_v2 }
  0x19   : > { %v3743_v3 = vld [vmem:[#allocation2] sm:$0xff]  ;;  %v3745_v4 = vld [vmem:[#allocation2 + $0x8] sm:$0xff] }
  0x1a   : > { %3499 = vmatprep.mubr.msk.f32.mxu0 %vm275_vm2, %v3743_v3 }
  0x1b   : > { %3500 = vmatmul.mubr.msk.f32.vlgmr.msra.gmra.mxu0 %vm275_vm2, %v3745_v4 }
  0xdb   : > { %v3501_v5 = vpop.f32.mrf.mxu0 }
  0xdc   : > { %v358_v9 = vadd.f32 %v3501_v5, %v3371_v6  ;;  %v544_v5 = vld [vmem:[%s3723_s25 + $0x10] sm:$0x3f] }
  0xdd   : > { %v352_v7 = vpop.f32.mrf.mxu0 }
  0xde   : > { %v353_v8 = vadd.f32 %v3371_v6, %v352_v7  ;;  %v3674_v6 = vmov 0.0   ;;  %v547_v7 = vld [vmem:[%s3723_s25 + $0x28] sm:$0x3f] }
  0xdf   : > { %766 = vmatprep.mubr.f32.mxu0 %v3674_v6 }
  0xe0   : > { %376 = vrot.lane.b32.xlu1 %v353_v8, %s3672_s11  ;;  %362 = vrot.lane.b32.xlu0 %v353_v8, %s3673_s12 }
  0xe4   : > { %385 = vrot.lane.b32.xlu1 %v358_v9, %s3672_s11  ;;  %367 = vrot.lane.b32.xlu0 %v358_v9, %s3673_s12 }
 0x152   : > { %v363_v11 = vpop.permute.xlu0 %362  ;;  %v377_v33 = vpop.permute.xlu1 %376 }
 0x153   : > { %v365_v13 = vmul.f32 %v363_v11, %v353_v8  ;;  %v393_v14 = vmul.f32 %v363_v11, %v358_v9 }
 0x156   : > { %v368_v12 = vpop.permute.xlu0 %367  ;;  %v386_v34 = vpop.permute.xlu1 %385 }
 0x157   : > { %v370_v15 = vmul.f32 %v368_v12, %v353_v8  ;;  %v394_v16 = vmul.f32 %v368_v12, %v358_v9  ;;  %v549_v8 = vld [vmem:[%s3723_s25 + $0x38] sm:$0x3f] }
 0x159   : > { %v371_v17 = vmax.f32 %v365_v13, %v370_v15  ;;  %v395_v18 = vmax.f32 %v393_v14, %v394_v16 }
 0x15b   : > { %v372_v19 = vsub.f32 %v365_v13, %v371_v17  ;;  %v381_v20 = vsub.f32 %v370_v15, %v371_v17  ;;  %v396_v21 = vsub.f32 %v393_v14, %v395_v18  ;;  %v402_v22 = vsub.f32 %v394_v16, %v395_v18  ;;  %v3379_v16 = vld [vmem:[%s3733_s6 + $0x12] ss:$0 sm:$0xff]  ;;  %v3380_v18 = vld [vmem:[%s3733_s6 + $0x13] ss:$0 sm:$0xff] }
 0x15d   : > { %v373_v23 = vmul.f32 1.442695, %v372_v19  ;;  %v382_v24 = vmul.f32 1.442695, %v381_v20  ;;  %v397_v25 = vmul.f32 1.442695, %v396_v21 }
 0x15e   : > { %v403_v26 = vmul.f32 1.442695, %v402_v22 }
 0x15f   : > { %3608 = vpow2.f32 %v373_v23  ;;  %v546_v23 = vld [vmem:[%s3723_s25 + $0x20] sm:$0x3f] }
 0x160   : > { %3610 = vpow2.f32 %v382_v24  ;;  %v548_v24 = vld [vmem:[%s3723_s25 + $0x30] sm:$0x3f] }
 0x161   : > { %3612 = vpow2.f32 %v397_v25 }
 0x162   : > { %3614 = vpow2.f32 %v403_v26  ;;  %v551_v26 = vld [vmem:[%s3723_s25 + $0x48] sm:$0x3f] }
 0x16c   : > { %v3609_v27 = vpop.eup %3608 }
 0x16d   : > { %v3611_v28 = vpop.eup %3610  ;;  %v379_v35 = vmul.f32 %v3609_v27, %v377_v33 }
 0x16e   : > { %v3613_v29 = vpop.eup %3612  ;;  %v384_v30 = vadd.f32 %v3611_v28, %v3609_v27  ;;  %v388_v36 = vmul.f32 %v3611_v28, %v386_v34  ;;  %v553_v27 = vld [vmem:[%s3723_s25 + $0x58] sm:$0x3f] }
 0x16f   : > { %v3615_v31 = vpop.eup %3614  ;;  %v400_v37 = vmul.f32 %v3613_v29, %v377_v33  ;;  %v554_v33 = vld [vmem:[%s3723_s25 + $0x60] sm:$0x3f] }
 0x170   : > { %3616 = vrcp.f32 %v384_v30  ;;  %v405_v32 = vadd.f32 %v3615_v31, %v3613_v29  ;;  %v406_v38 = vmul.f32 %v3615_v31, %v386_v34  ;;  %v389_v39 = vadd.f32 %v388_v36, %v379_v35  ;;  %v550_v29 = vld [vmem:[%s3723_s25 + $0x40] sm:$0x3f]  ;;  %v552_v30 = vld [vmem:[%s3723_s25 + $0x50] sm:$0x3f]  ;;  %v555_v31 = vld [vmem:[%s3723_s25 + $0x68] sm:$0x3f] }
 0x171   : > { %v556_v34 = vld [vmem:[%s3723_s25 + $0x70] sm:$0x3f]  ;;  %v1351_v35 = vld [vmem:[%s3728_s28 + $0x8] sm:$0x3f]  ;;  %v1350_v36 = vld [vmem:[%s3728_s28] sm:$0x3f] }
 0x172   : > { %3618 = vrcp.f32 %v405_v32  ;;  %v407_v42 = vadd.f32 %v406_v38, %v400_v37  ;;  %v557_v32 = vld [vmem:[%s3723_s25 + $0x78] sm:$0x3f]  ;;  %v1352_v38 = vld [vmem:[%s3728_s28 + $0x10] sm:$0x3f] }
 0x173   : > { %v1353_v37 = vld [vmem:[%s3728_s28 + $0x18] sm:$0x3f] }
 0x17d   : > { %v3617_v40 = vpop.eup %3616 }
 0x17e   : > { %v391_v41 = vmul.f32 %v3617_v40, %v389_v39  ;;  %v1355_v39 = vld [vmem:[%s3728_s28 + $0x28] sm:$0x3f]  ;;  %v1357_v40 = vld [vmem:[%s3728_s28 + $0x38] sm:$0x3f] }
 0x17f   : > { %v3619_v43 = vpop.eup %3618 }
 0x180   : > { %392 = vst.msk [vmem:[#allocation3] sm:$0xff] %vm275_vm2, %v391_v41  ;;  %v409_v44 = vmul.f32 %v3619_v43, %v407_v42  ;;  %v568_v41 = vlaneseq  ;;  %v3381_v43 = vld [vmem:[%s3723_s25 + $0x6] ss:$8 sm:$0xf] }
 0x182   : > { %410 = vst.msk [vmem:[#allocation3 + $0x8] sm:$0xff] %vm275_vm2, %v409_v44  ;;  %v3860_v42 = vshrl.u32 %v568_v41, 7  ;;  %v3382_v44 = vld [vmem:[%s3723_s25 + $0x6] ss:$8 sm:$0xf0] }
 0x187   : > { %v411_v45 = vld [vmem:[#allocation3] sm:$0xff] }
 0x188   : > { %3504 = vmatprep.mubr.msk.f32.mxu1 %vm275_vm2, %v411_v45  ;;  %v561_v45 = vor.u32 %v3382_v44, %v3381_v43 }
 0x189   : > { %v412_v46 = vld [vmem:[#allocation3 + $0x8] sm:$0xff] }
 0x18a   : > { %3505 = vmatmul.mubr.msk.f32.vlgmr.msra.gmra.mxu1 %vm275_vm2, %v412_v46  ;;  %v570_v46 = vsub.s32 0, %v3860_v42 }
 0x18b   : > { %843 = vmatprep.mubr.f32.mxu1 %v3674_v6 }
 0x24a   : > { %v3506_v48 = vpop.f32.mrf.mxu1 }
 0x24b   : > { %v498_v49 = vadd.f32 %v3506_v48, %v3375_v47  ;;  %v574_v48 = vsub.s32 1, %v3860_v42 }
 0x24c   : > { %v492_v50 = vpop.f32.mrf.mxu1 }
 0x24d   : > { %v493_v51 = vadd.f32 %v3375_v47, %v492_v50  ;;  %v502_v52 = vadd.f32 %v498_v49, %v3745_v4  ;;  %v542_v4 = vld [vmem:[%s3723_s25] sm:$0x3f]  ;;  %v578_v47 = vsub.s32 2, %v3860_v42  ;;  %v582_v49 = vsub.s32 3, %v3860_v42 }
 0x24e   : > { %3386 = vmatpush1.msk.msra.mxu0 %vm282_vm1, %v542_v4  ;;  %v571_v50 = vrot.slane %v561_v45, %v570_v46 }
 0x24f   : > { %v506_v53 = vsel %vm275_vm2, %v502_v52, 0.0  ;;  %v501_v54 = vadd.f32 %v493_v51, %v3743_v3  ;;  %v545_v3 = vld [vmem:[%s3723_s25 + $0x18] sm:$0x3f]  ;;  %3393 = vmatprep.subr.msk.mxu0 %vm282_vm1, %v547_v7  ;;  %v579_v51 = vrot.slane %v561_v45, %v578_v47 }
 0x250   : > { %507 = vadd.xlane.f32.xlu1 %v506_v53  ;;  %3389 = vmatprep.subr.msk.mxu1 %vm282_vm1, %v545_v3  ;;  %v583_v53 = vrot.slane %v561_v45, %v582_v49 }
 0x251   : > { %v503_v55 = vsel %vm275_vm2, %v501_v54, 0.0  ;;  %3390 = vmatpush1.msk.msra.mxu1 %vm282_vm1, %v544_v5  ;;  %v3383_v5 = vld [vmem:[%s3723_s25 + $0x46] ss:$8 sm:$0xf] }
 0x252   : > { %504 = vadd.xlane.f32.xlu0 %v503_v55  ;;  %3397 = vmatprep.subr.msk.mxu1 %vm282_vm1, %v549_v8 }
 0x2d9   : > { %v508_v56 = vpop.xlane.xlu1 %507 }
 0x2da   : > { %v511_v57 = vmul.f32 0.16666667, %v508_v56  ;;  %v586_v56 = vsub.s32 4, %v3860_v42 }
 0x2db   : > { %v505_v58 = vpop.xlane.xlu0 %504 }
 0x2dc   : > { %v510_v59 = vmul.f32 0.16666667, %v505_v58  ;;  %v513_v60 = vsub.f32 %v502_v52, %v511_v57  ;;  %v575_v52 = vrot.slane %v561_v45, %v574_v48  ;;  %v594_v57 = vsub.s32 6, %v3860_v42 }
 0x2dd   : > { %v590_v58 = vsub.s32 5, %v3860_v42  ;;  %v587_v4 = vrot.slane %v561_v45, %v586_v56 }
 0x2de   : > { %v512_v61 = vsub.f32 %v501_v54, %v510_v59  ;;  %v515_v0 = vmul.f32 %v513_v60, %v513_v60  ;;  %v595_v8 = vrot.slane %v561_v45, %v594_v57 }
 0x2e0   : > { %v514_v62 = vmul.f32 %v512_v61, %v512_v61  ;;  %v519_v1 = vsel %vm275_vm2, %v515_v0, 0.0 }
 0x2e2   : > { %v516_v63 = vsel %vm275_vm2, %v514_v62, 0.0 }
 0x2e3   : > { %517 = vadd.xlane.f32.xlu0 %v516_v63 }
 0x2e7   : > { %520 = vadd.xlane.f32.xlu0 %v519_v1  ;;  %v598_v1 = vsub.s32 7, %v3860_v42 }
 0x36c   : > { %v518_v9 = vpop.xlane.xlu0 %517 }
 0x36d   : > { %v522_v10 = vmul.f32 0.16666667, %v518_v9  ;;  %v591_v9 = vrot.slane %v561_v45, %v590_v58 }
 0x36f   : > { %v524_v11 = vadd.f32 1e-05, %v522_v10  ;;  %v3384_v10 = vld [vmem:[%s3723_s25 + $0x46] ss:$8 sm:$0xf0] }
 0x370   : > { %v521_v12 = vpop.xlane.xlu0 %520 }
 0x371   : > { %3620 = vrsqrt.f32 %v524_v11  ;;  %v523_v13 = vmul.f32 0.16666667, %v521_v12 }
 0x373   : > { %v525_v14 = vadd.f32 1e-05, %v523_v13 }
 0x375   : > { %3622 = vrsqrt.f32 %v525_v14 }
 0x37e   : > { %v3621_v15 = vpop.eup %3620 }
 0x37f   : > { %v528_v17 = vmul.f32 %v3621_v15, %v512_v61 }
 0x381   : > { %v534_v19 = vmul.f32 %v3379_v16, %v528_v17  ;;  %v1354_v17 = vld [vmem:[%s3728_s28 + $0x20] sm:$0x3f] }
 0x382   : > { %v3623_v20 = vpop.eup %3622 }
 0x383   : > { %v3784_v21 = vadd.f32 %v3380_v18, %v534_v19  ;;  %v529_v22 = vmul.f32 %v3623_v20, %v513_v60 }
 0x385   : > { %v535_v25 = vmul.f32 %v3379_v16, %v529_v22  ;;  %3387 = vmatmul.mubr.msk.f32.vlgmr.msra.gmra.mxu0 %vm275_vm2, %v3784_v21  ;;  %3391 = vmatmul.mubr.msk.f32.vlgmr.msra.gmra.mxu1 %vm275_vm2, %v3784_v21  ;;  %v599_v22 = vrot.slane %v561_v45, %v598_v1 }
 0x386   : > { %3394 = vmatpush1.msk.msra.mxu0 %vm282_vm1, %v546_v23  ;;  %3398 = vmatpush1.msk.msra.mxu1 %vm282_vm1, %v548_v24  ;;  %v1359_v23 = vld [vmem:[%s3728_s28 + $0x48] sm:$0x3f]  ;;  %v1361_v24 = vld [vmem:[%s3728_s28 + $0x58] sm:$0x3f] }
 0x387   : > { %v3796_v28 = vadd.f32 %v3380_v18, %v535_v25  ;;  %772 = vmatprep.mubr.f32.mxu0 %v3674_v6  ;;  %849 = vmatprep.mubr.f32.mxu1 %v3674_v6  ;;  %v1356_v18 = vld [vmem:[%s3728_s28 + $0x30] sm:$0x3f] }
 0x388   : > { %3401 = vmatprep.subr.msk.mxu0 %vm282_vm1, %v551_v26  ;;  %3405 = vmatprep.subr.msk.mxu1 %vm282_vm1, %v553_v27  ;;  %v3894_v27 = vor.u32 %v3384_v10, %v3383_v5 }
 0x389   : > { %3388 = vmatmul.mubr.msk.f32.gmra.mxu0 %vm275_vm2, %v3796_v28  ;;  %3392 = vmatmul.mubr.msk.f32.gmra.mxu1 %vm275_vm2, %v3796_v28 }
 0x38a   : > { %920 = vmatprep.mubr.f32.mxu0 %v3674_v6  ;;  %997 = vmatprep.mubr.f32.mxu1 %v3674_v6  ;;  %v603_v41 = vrot.slane %v3894_v27, %v570_v46  ;;  %v611_v45 = vrot.slane %v3894_v27, %v578_v47  ;;  %v1360_v46 = vld [vmem:[%s3728_s28 + $0x50] sm:$0x3f]  ;;  %v615_v47 = vrot.slane %v3894_v27, %v582_v49 }
 0x38d   : > { %3395 = vmatmul.mubr.msk.f32.vlgmr.msra.gmra.mxu0 %vm275_vm2, %v3784_v21  ;;  %3399 = vmatmul.mubr.msk.f32.vlgmr.msra.gmra.mxu1 %vm275_vm2, %v3784_v21 }
 0x38e   : > { %3402 = vmatpush1.msk.msra.mxu0 %vm282_vm1, %v550_v29  ;;  %3406 = vmatpush1.msk.msra.mxu1 %vm282_vm1, %v552_v30 }
 0x38f   : > { %926 = vmatprep.mubr.f32.mxu0 %v3674_v6  ;;  %1003 = vmatprep.mubr.f32.mxu1 %v3674_v6 }
 0x390   : > { %3409 = vmatprep.subr.msk.mxu0 %vm282_vm1, %v555_v31  ;;  %3413 = vmatprep.subr.msk.mxu1 %vm282_vm1, %v557_v32 }
 0x391   : > { %3396 = vmatmul.mubr.msk.f32.gmra.mxu0 %vm275_vm2, %v3796_v28  ;;  %3400 = vmatmul.mubr.msk.f32.gmra.mxu1 %vm275_vm2, %v3796_v28 }
 0x392   : > { %1074 = vmatprep.mubr.f32.mxu0 %v3674_v6  ;;  %1151 = vmatprep.mubr.f32.mxu1 %v3674_v6 }
 0x395   : > { %3403 = vmatmul.mubr.msk.f32.vlgmr.msra.gmra.mxu0 %vm275_vm2, %v3784_v21  ;;  %3407 = vmatmul.mubr.msk.f32.vlgmr.msra.gmra.mxu1 %vm275_vm2, %v3784_v21 }
 0x396   : > { %3410 = vmatpush1.msk.msra.mxu0 %vm282_vm1, %v554_v33  ;;  %3414 = vmatpush1.msk.msra.mxu1 %vm282_vm1, %v556_v34 }
 0x397   : > { %1080 = vmatprep.mubr.f32.mxu0 %v3674_v6  ;;  %1157 = vmatprep.mubr.f32.mxu1 %v3674_v6 }
 0x398   : > { %1400 = vmatprep.subr.mxu0 %v1351_v35  ;;  %1475 = vmatprep.subr.mxu1 %v1353_v37 }
 0x399   : > { %3404 = vmatmul.mubr.msk.f32.gmra.mxu0 %vm275_vm2, %v3796_v28  ;;  %3408 = vmatmul.mubr.msk.f32.gmra.mxu1 %vm275_vm2, %v3796_v28 }
 0x39a   : > { %1228 = vmatprep.mubr.f32.mxu0 %v3674_v6  ;;  %1305 = vmatprep.mubr.f32.mxu1 %v3674_v6 }
 0x39d   : > { %3411 = vmatmul.mubr.msk.f32.vlgmr.msra.gmra.mxu0 %vm275_vm2, %v3784_v21  ;;  %3415 = vmatmul.mubr.msk.f32.vlgmr.msra.gmra.mxu1 %vm275_vm2, %v3784_v21 }
 0x39e   : > { %1234 = vmatprep.mubr.f32.mxu0 %v3674_v6  ;;  %1311 = vmatprep.mubr.f32.mxu1 %v3674_v6 }
 0x39f   : > { %1401 = vmatpush1.xpose.msra.mxu0 %v1350_v36  ;;  %1476 = vmatpush1.xpose.msra.mxu1 %v1352_v38 }
 0x3a0   : > { %1550 = vmatprep.subr.mxu0 %v1355_v39  ;;  %1625 = vmatprep.subr.mxu1 %v1357_v40 }
 0x3a1   : > { %3412 = vmatmul.mubr.msk.f32.gmra.mxu0 %vm275_vm2, %v3796_v28  ;;  %3416 = vmatmul.mubr.msk.f32.gmra.mxu1 %vm275_vm2, %v3796_v28 }
 0x445   : > { %v768_v54 = vpop.f32.mrf.mxu0  ;;  %v845_v55 = vpop.f32.mrf.mxu1 }
 0x446   : > { %v769_v59 = vadd.f32 %v768_v54, %v571_v50  ;;  %v846_v60 = vadd.f32 %v845_v55, %v579_v51 }
 0x447   : > { %v770_v61 = vpop.f32.mrf.mxu0  ;;  %v847_v62 = vpop.f32.mrf.mxu1 }
 0x448   : > { %v771_v63 = vadd.f32 %v770_v61, %v575_v52  ;;  %v848_v0 = vadd.f32 %v847_v62, %v583_v53  ;;  %v1318_v11 = vmax.f32 %v769_v59, 0.0  ;;  %v1320_v12 = vmax.f32 %v846_v60, 0.0  ;;  %v1358_v60 = vld [vmem:[%s3728_s28 + $0x40] sm:$0x3f] }
 0x449   : > { %v774_v2 = vpop.f32.mrf.mxu0  ;;  %v851_v3 = vpop.f32.mrf.mxu1 }
 0x44a   : > { %v1319_v6 = vmax.f32 %v771_v63, 0.0  ;;  %v1321_v7 = vmax.f32 %v848_v0, 0.0  ;;  %v775_v13 = vadd.f32 %v774_v2, %v571_v50  ;;  %v852_v14 = vadd.f32 %v851_v3, %v579_v51  ;;  %v1363_v63 = vld [vmem:[%s3728_s28 + $0x68] sm:$0x3f]  ;;  %v1365_v0 = vld [vmem:[%s3728_s28 + $0x78] sm:$0x3f] }
 0x44b   : > { %v776_v15 = vpop.f32.mrf.mxu0  ;;  %v853_v16 = vpop.f32.mrf.mxu1  ;;  %v607_v50 = vrot.slane %v3894_v27, %v574_v48 }
 0x44c   : > { %v777_v19 = vadd.f32 %v776_v15, %v575_v52  ;;  %v854_v20 = vadd.f32 %v853_v16, %v583_v53  ;;  %1434 = vmatprep.mubr.f32.mxu0 %v1319_v6  ;;  %1509 = vmatprep.mubr.f32.mxu1 %v1321_v7  ;;  %v1334_v31 = vmax.f32 %v775_v13, 0.0  ;;  %v1336_v32 = vmax.f32 %v852_v14, 0.0 }
 0x44d   : > { %v922_v25 = vpop.f32.mrf.mxu0  ;;  %v999_v26 = vpop.f32.mrf.mxu1  ;;  %1435 = vmatmul.mubr.f32.vlgmr.msra.gmra.mxu0 %v1318_v11  ;;  %1510 = vmatmul.mubr.f32.vlgmr.msra.gmra.mxu1 %v1320_v12  ;;  %v619_v14 = vrot.slane %v3894_v27, %v586_v56 }
 0x44e   : > { %v1335_v29 = vmax.f32 %v777_v19, 0.0  ;;  %v1337_v30 = vmax.f32 %v854_v20, 0.0  ;;  %1551 = vmatpush1.xpose.msra.mxu0 %v1354_v17  ;;  %1626 = vmatpush1.xpose.msra.mxu1 %v1356_v18  ;;  %v923_v33 = vadd.f32 %v922_v25, %v587_v4  ;;  %v1000_v34 = vadd.f32 %v999_v26, %v595_v8  ;;  %v1362_v26 = vld [vmem:[%s3728_s28 + $0x60] sm:$0x3f] }
 0x44f   : > { %v924_v35 = vpop.f32.mrf.mxu0  ;;  %v1001_v36 = vpop.f32.mrf.mxu1  ;;  %1700 = vmatprep.subr.mxu0 %v1359_v23  ;;  %1775 = vmatprep.subr.mxu1 %v1361_v24  ;;  %v627_v17 = vrot.slane %v3894_v27, %v594_v57  ;;  %v623_v18 = vrot.slane %v3894_v27, %v590_v58  ;;  %v631_v57 = vrot.slane %v3894_v27, %v598_v1 }
 0x450   : > { %v925_v37 = vadd.f32 %v924_v35, %v591_v9  ;;  %v1002_v38 = vadd.f32 %v1001_v36, %v599_v22  ;;  %1439 = vmatprep.mubr.f32.mxu0 %v1335_v29  ;;  %1514 = vmatprep.mubr.f32.mxu1 %v1337_v30  ;;  %v1322_v51 = vmax.f32 %v923_v33, 0.0  ;;  %v1324_v52 = vmax.f32 %v1000_v34, 0.0  ;;  %v1364_v29 = vld [vmem:[%s3728_s28 + $0x70] sm:$0x3f] }
 0x451   : > { %v928_v39 = vpop.f32.mrf.mxu0  ;;  %v1005_v40 = vpop.f32.mrf.mxu1  ;;  %1440 = vmatmul.mubr.f32.gmra.mxu0 %v1334_v31  ;;  %1515 = vmatmul.mubr.f32.gmra.mxu1 %v1336_v32 }
 0x452   : > { %v1323_v43 = vmax.f32 %v925_v37, 0.0  ;;  %v1325_v44 = vmax.f32 %v1002_v38, 0.0  ;;  %v929_v53 = vadd.f32 %v928_v39, %v587_v4  ;;  %v1006_v54 = vadd.f32 %v1005_v40, %v595_v8 }
 0x453   : > { %v930_v55 = vpop.f32.mrf.mxu0  ;;  %v1007_v59 = vpop.f32.mrf.mxu1 }
 0x454   : > { %v931_v61 = vadd.f32 %v930_v55, %v591_v9  ;;  %v1008_v62 = vadd.f32 %v1007_v59, %v599_v22  ;;  %1584 = vmatprep.mubr.f32.mxu0 %v1323_v43  ;;  %1659 = vmatprep.mubr.f32.mxu1 %v1325_v44  ;;  %v1338_v5 = vmax.f32 %v929_v53, 0.0  ;;  %v1340_v6 = vmax.f32 %v1006_v54, 0.0 }
 0x455   : > { %v1076_v2 = vpop.f32.mrf.mxu0  ;;  %v1153_v48 = vpop.f32.mrf.mxu1  ;;  %1585 = vmatmul.mubr.f32.vlgmr.msra.gmra.mxu0 %v1322_v51  ;;  %1660 = vmatmul.mubr.f32.vlgmr.msra.gmra.mxu1 %v1324_v52 }
 0x456   : > { %v1339_v3 = vmax.f32 %v931_v61, 0.0  ;;  %v1341_v4 = vmax.f32 %v1008_v62, 0.0  ;;  %1701 = vmatpush1.xpose.msra.mxu0 %v1358_v60  ;;  %1776 = vmatpush1.xpose.msra.mxu1 %v1360_v46  ;;  %v1077_v7 = vadd.f32 %v1076_v2, %v603_v41  ;;  %v1154_v8 = vadd.f32 %v1153_v48, %v611_v45  ;;  %v3417_v2 = vld [vmem:[%s3733_s6 + $0x16] ss:$0 sm:$0xff] }
 0x457   : > { %v1078_v9 = vpop.f32.mrf.mxu0  ;;  %v1155_v10 = vpop.f32.mrf.mxu1  ;;  %1850 = vmatprep.subr.mxu0 %v1363_v63  ;;  %1925 = vmatprep.subr.mxu1 %v1365_v0 }
 0x458   : > { %v1079_v11 = vadd.f32 %v1078_v9, %v607_v50  ;;  %v1156_v49 = vadd.f32 %v1155_v10, %v615_v47  ;;  %1589 = vmatprep.mubr.f32.mxu0 %v1339_v3  ;;  %1664 = vmatprep.mubr.f32.mxu1 %v1341_v4  ;;  %v1326_v19 = vmax.f32 %v1077_v7, 0.0  ;;  %v1328_v20 = vmax.f32 %v1154_v8, 0.0 }
 0x459   : > { %v1082_v12 = vpop.f32.mrf.mxu0  ;;  %v1159_v13 = vpop.f32.mrf.mxu1  ;;  %1590 = vmatmul.mubr.f32.gmra.mxu0 %v1338_v5  ;;  %1665 = vmatmul.mubr.f32.gmra.mxu1 %v1340_v6 }
 0x45a   : > { %v1327_v15 = vmax.f32 %v1079_v11, 0.0  ;;  %v1329_v16 = vmax.f32 %v1156_v49, 0.0  ;;  %v1083_v22 = vadd.f32 %v1082_v12, %v603_v41  ;;  %v1160_v23 = vadd.f32 %v1159_v13, %v611_v45 }
 0x45b   : > { %v1084_v24 = vpop.f32.mrf.mxu0  ;;  %v1161_v25 = vpop.f32.mrf.mxu1 }
 0x45c   : > { %v1085_v30 = vadd.f32 %v1084_v24, %v607_v50  ;;  %v1162_v56 = vadd.f32 %v1161_v25, %v615_v47  ;;  %1734 = vmatprep.mubr.f32.mxu0 %v1327_v15  ;;  %1809 = vmatprep.mubr.f32.mxu1 %v1329_v16  ;;  %v1342_v34 = vmax.f32 %v1083_v22, 0.0  ;;  %v1344_v35 = vmax.f32 %v1160_v23, 0.0 }
 0x45d   : > { %v1230_v31 = vpop.f32.mrf.mxu0  ;;  %v1307_v32 = vpop.f32.mrf.mxu1  ;;  %1735 = vmatmul.mubr.f32.vlgmr.msra.gmra.mxu0 %v1326_v19  ;;  %1810 = vmatmul.mubr.f32.vlgmr.msra.gmra.mxu1 %v1328_v20 }
 0x45e   : > { %v1343_v58 = vmax.f32 %v1085_v30, 0.0  ;;  %v1345_v33 = vmax.f32 %v1162_v56, 0.0  ;;  %1851 = vmatpush1.xpose.msra.mxu0 %v1362_v26  ;;  %1926 = vmatpush1.xpose.msra.mxu1 %v1364_v29  ;;  %v1231_v36 = vadd.f32 %v1230_v31, %v619_v14  ;;  %v1308_v37 = vadd.f32 %v1307_v32, %v627_v17 }
 0x45f   : > { %v1232_v38 = vpop.f32.mrf.mxu0  ;;  %v1309_v39 = vpop.f32.mrf.mxu1 }
 0x460   : > { %v1233_v40 = vadd.f32 %v1232_v38, %v623_v18  ;;  %v1310_v41 = vadd.f32 %v1309_v39, %v631_v57  ;;  %1739 = vmatprep.mubr.f32.mxu0 %v1343_v58  ;;  %1814 = vmatprep.mubr.f32.mxu1 %v1345_v33  ;;  %v1330_v44 = vmax.f32 %v1231_v36, 0.0  ;;  %v1332_v45 = vmax.f32 %v1308_v37, 0.0 }
 0x461   : > { %v1236_v42 = vpop.f32.mrf.mxu0  ;;  %v1313_v1 = vpop.f32.mrf.mxu1  ;;  %1740 = vmatmul.mubr.f32.gmra.mxu0 %v1342_v34  ;;  %1815 = vmatmul.mubr.f32.gmra.mxu1 %v1344_v35 }
 0x462   : > { %v1331_v27 = vmax.f32 %v1233_v40, 0.0  ;;  %v1333_v43 = vmax.f32 %v1310_v41, 0.0  ;;  %v1237_v50 = vadd.f32 %v1236_v42, %v619_v14  ;;  %v1314_v51 = vadd.f32 %v1313_v1, %v627_v17 }
 0x463   : > { %v1238_v52 = vpop.f32.mrf.mxu0  ;;  %v1315_v53 = vpop.f32.mrf.mxu1 }
 0x464   : > { %v1239_v54 = vadd.f32 %v1238_v52, %v623_v18  ;;  %v1316_v55 = vadd.f32 %v1315_v53, %v631_v57  ;;  %1884 = vmatprep.mubr.f32.mxu0 %v1331_v27  ;;  %1959 = vmatprep.mubr.f32.mxu1 %v1333_v43  ;;  %v1346_v46 = vmax.f32 %v1237_v50, 0.0  ;;  %v1348_v61 = vmax.f32 %v1314_v51, 0.0 }
 0x465   : > { %1885 = vmatmul.mubr.f32.vlgmr.msra.gmra.mxu0 %v1330_v44  ;;  %1960 = vmatmul.mubr.f32.vlgmr.msra.gmra.mxu1 %v1332_v45 }
 0x466   : > { %v1347_v59 = vmax.f32 %v1239_v54, 0.0  ;;  %v1349_v60 = vmax.f32 %v1316_v55, 0.0 }
 0x468   : > { %1889 = vmatprep.mubr.f32.mxu0 %v1347_v59  ;;  %1964 = vmatprep.mubr.f32.mxu1 %v1349_v60 }
 0x469   : > { %1890 = vmatmul.mubr.f32.gmra.mxu0 %v1346_v46  ;;  %1965 = vmatmul.mubr.f32.gmra.mxu1 %v1348_v61 }
 0x50d   : > { %v1436_v62 = vpop.f32.mrf.mxu0  ;;  %v1511_v47 = vpop.f32.mrf.mxu1 }
 0x50e   : > { %v1437_v6 = vadd.f32 %v3417_v2, %v1436_v62 }
 0x50f   : > { %v1438_v63 = vpop.f32.mrf.mxu0  ;;  %v1513_v0 = vpop.f32.mrf.mxu1 }
 0x510   : > { %v1512_v11 = vadd.f32 %v1511_v47, %v1437_v6 }
 0x511   : > { %v1441_v48 = vpop.f32.mrf.mxu0  ;;  %v1516_v3 = vpop.f32.mrf.mxu1 }
 0x512   : > { %v1442_v49 = vadd.f32 %v3417_v2, %v1441_v48 }
 0x513   : > { %v1443_v4 = vpop.f32.mrf.mxu0  ;;  %v1518_v5 = vpop.f32.mrf.mxu1 }
 0x514   : > { %v1517_v17 = vadd.f32 %v1516_v3, %v1442_v49  ;;  %v3418_v3 = vld [vmem:[%s3733_s6 + $0x14] ss:$0 sm:$0xff]  ;;  %v3419_v5 = vld [vmem:[%s3733_s6 + $0x15] ss:$0 sm:$0xff] }
 0x515   : > { %v1586_v7 = vpop.f32.mrf.mxu0  ;;  %v1661_v8 = vpop.f32.mrf.mxu1 }
 0x516   : > { %v1587_v14 = vadd.f32 %v1586_v7, %v1512_v11 }
 0x517   : > { %v1588_v9 = vpop.f32.mrf.mxu0  ;;  %v1663_v10 = vpop.f32.mrf.mxu1 }
 0x518   : > { %v1662_v20 = vadd.f32 %v1661_v8, %v1587_v14 }
 0x519   : > { %v1591_v12 = vpop.f32.mrf.mxu0  ;;  %v1666_v13 = vpop.f32.mrf.mxu1 }
 0x51a   : > { %v1592_v22 = vadd.f32 %v1591_v12, %v1517_v17 }
 0x51b   : > { %v1593_v15 = vpop.f32.mrf.mxu0  ;;  %v1668_v16 = vpop.f32.mrf.mxu1 }
 0x51c   : > { %v1667_v30 = vadd.f32 %v1666_v13, %v1592_v22 }
 0x51d   : > { %v1736_v18 = vpop.f32.mrf.mxu0  ;;  %v1811_v19 = vpop.f32.mrf.mxu1 }
 0x51e   : > { %v1737_v25 = vadd.f32 %v1736_v18, %v1662_v20 }
 0x51f   : > { %v1738_v23 = vpop.f32.mrf.mxu0  ;;  %v1813_v24 = vpop.f32.mrf.mxu1 }
 0x520   : > { %v1812_v31 = vadd.f32 %v1811_v19, %v1737_v25 }
 0x521   : > { %v1741_v26 = vpop.f32.mrf.mxu0  ;;  %v1816_v29 = vpop.f32.mrf.mxu1 }
 0x522   : > { %v1742_v32 = vadd.f32 %v1741_v26, %v1667_v30 }
 0x523   : > { %v1743_v56 = vpop.f32.mrf.mxu0  ;;  %v1818_v57 = vpop.f32.mrf.mxu1 }
 0x524   : > { %v1817_v37 = vadd.f32 %v1816_v29, %v1742_v32 }
 0x525   : > { %v1886_v58 = vpop.f32.mrf.mxu0  ;;  %v1961_v33 = vpop.f32.mrf.mxu1 }
 0x526   : > { %v1887_v34 = vadd.f32 %v1886_v58, %v1812_v31 }
 0x527   : > { %v1888_v35 = vpop.f32.mrf.mxu0  ;;  %v1963_v36 = vpop.f32.mrf.mxu1 }
 0x528   : > { %v1962_v38 = vadd.f32 %v1961_v33, %v1887_v34 }
 0x529   : > { %v1891_v39 = vpop.f32.mrf.mxu0  ;;  %v1966_v40 = vpop.f32.mrf.mxu1 }
 0x52a   : > { %v1892_v41 = vadd.f32 %v1891_v39, %v1817_v37  ;;  %v1970_v42 = vadd.f32 %v1962_v38, %v3784_v21 }
 0x52b   : > { %v1893_v1 = vpop.f32.mrf.mxu0  ;;  %v1968_v27 = vpop.f32.mrf.mxu1 }
 0x52c   : > { %v1967_v43 = vadd.f32 %v1966_v40, %v1892_v41  ;;  %v1972_v44 = vsel %vm275_vm2, %v1970_v42, 0.0 }
 0x52d   : > { %1973 = vadd.xlane.f32.xlu1 %v1972_v44 }
 0x52e   : > { %v1971_v45 = vadd.f32 %v1967_v43, %v3796_v28 }
 0x530   : > { %v1975_v50 = vsel %vm275_vm2, %v1971_v45, 0.0 }
 0x531   : > { %1976 = vadd.xlane.f32.xlu0 %v1975_v50 }
 0x5b6   : > { %v1974_v51 = vpop.xlane.xlu1 %1973 }
 0x5b7   : > { %v1978_v52 = vmul.f32 0.16666667, %v1974_v51 }
 0x5b9   : > { %v1980_v53 = vsub.f32 %v1970_v42, %v1978_v52 }
 0x5ba   : > { %v1977_v54 = vpop.xlane.xlu0 %1976 }
 0x5bb   : > { %v1979_v55 = vmul.f32 0.16666667, %v1977_v54  ;;  %v1982_v59 = vmul.f32 %v1980_v53, %v1980_v53 }
 0x5bd   : > { %v1981_v60 = vsub.f32 %v1971_v45, %v1979_v55  ;;  %v1984_v21 = vsel %vm275_vm2, %v1982_v59, 0.0 }
 0x5be   : > { %1985 = vadd.xlane.f32.xlu1 %v1984_v21 }
 0x5bf   : > { %v1983_v46 = vmul.f32 %v1981_v60, %v1981_v60 }
 0x5c1   : > { %v1987_v61 = vsel %vm275_vm2, %v1983_v46, 0.0 }
 0x5c2   : > { %1988 = vadd.xlane.f32.xlu0 %v1987_v61 }
 0x647   : > { %v1986_v28 = vpop.xlane.xlu1 %1985 }
 0x648   : > { %v1990_v62 = vmul.f32 0.16666667, %v1986_v28 }
 0x64a   : > { %v1992_v47 = vadd.f32 1e-05, %v1990_v62 }
 0x64b   : > { %v1989_v63 = vpop.xlane.xlu0 %1988 }
 0x64c   : > { %3624 = vrsqrt.f32 %v1992_v47  ;;  %v1991_v0 = vmul.f32 0.16666667, %v1989_v63 }
 0x64e   : > { %v1993_v2 = vadd.f32 1e-05, %v1991_v0 }
 0x650   : > { %3626 = vrsqrt.f32 %v1993_v2 }
 0x659   : > { %v3625_v48 = vpop.eup %3624 }
 0x65a   : > { %v1996_v4 = vmul.f32 %v3625_v48, %v1980_v53 }
 0x65c   : > { %v2002_v6 = vmul.f32 %v3418_v3, %v1996_v4 }
 0x65d   : > { %v3627_v7 = vpop.eup %3626 }
 0x65e   : > { %v2008_v8 = vadd.f32 %v3419_v5, %v2002_v6  ;;  %v1997_v9 = vmul.f32 %v3627_v7, %v1981_v60 }
 0x660   : > { %2010 = vst.msk [vmem:[#allocation2] sm:$0xff] %vm275_vm2, %v2008_v8  ;;  %v2003_v10 = vmul.f32 %v3418_v3, %v1997_v9  ;;  %2015 = sbr.rel (%p3420_p5) target bundleno = 2178 (0x882), region = 48 }
 0x662   : > { %v3936_v11 = vadd.f32 %v3419_v5, %v2003_v10 }
 0x664   : > { %2011 = vst.msk [vmem:[#allocation2 + $0x8] sm:$0xff] %vm275_vm2, %v3936_v11 }
 0x665   : > { %v2017_v49 = vld [vmem:[%s4108_s4] sm:$0x3f]  ;;  %v2095_v12 = vld [vmem:[%s4108_s4 + $0x6] sm:$0x3f]  ;;  %v3675_v13 = vmov 0.0   ;;  %vm3676_vm3 = vmmov 0  }
 0x666   : > { %3507 = vmatprep.subr.mxu0 %v3675_v13  ;;  %3509 = vmatprep.mubr.msk.f32.mxu0 %vm3676_vm3, %v3675_v13  ;;  %v2096_v14 = vrot.slane %v2008_v8, 1  ;;  %v2173_v15 = vld [vmem:[%s4108_s4 + $0xc] sm:$0x3f]  ;;  %v2174_v16 = vrot.slane %v2008_v8, 2  ;;  %v2251_v17 = vld [vmem:[%s4108_s4 + $0x12] sm:$0x3f] }
 0x667   : > { %3508 = vmatpush3.msk.msra.mxu0 %vm282_vm1, %v2017_v49  ;;  %3512 = vmatprep.subr.mxu1 %v3675_v13  ;;  %v2252_v18 = vrot.slane %v2008_v8, 3  ;;  %v2329_v19 = vld [vmem:[%s4108_s4 + $0x18] sm:$0x3f]  ;;  %v2330_v20 = vrot.slane %v2008_v8, 4  ;;  %v2407_v22 = vld [vmem:[%s4108_s4 + $0x1e] sm:$0x3f] }
 0x668   : > { %3510 = vmatmul.mubr.msk.f32.vlgmr.msra.gmra.mxu0 %vm275_vm2, %v2008_v8  ;;  %3513 = vmatpush3.msk.msra.mxu1 %vm282_vm1, %v2095_v12  ;;  %v2408_v23 = vrot.slane %v2008_v8, 5  ;;  %v2485_v24 = vld [vmem:[%s4108_s4 + $0x24] sm:$0x3f]  ;;  %v2486_v25 = vrot.slane %v2008_v8, 6  ;;  %v2563_v26 = vld [vmem:[%s4108_s4 + $0x2a] sm:$0x3f] }
 0x669   : > { %3514 = vmatprep.mubr.msk.f32.mxu1 %vm3676_vm3, %v3675_v13  ;;  %3517 = vmatprep.subr.mxu0 %v3675_v13  ;;  %v2564_v29 = vrot.slane %v2008_v8, 7  ;;  %v2655_v30 = vld [vmem:[%s4108_s4] sm:$0x3f]  ;;  %v2733_v56 = vld [vmem:[%s4108_s4 + $0x6] sm:$0x3f]  ;;  %v2734_v57 = vrot.slane %v3936_v11, 1 }
 0x66a   : > { %3515 = vmatmul.mubr.msk.f32.vlgmr.msra.gmra.mxu1 %vm275_vm2, %v2096_v14  ;;  %3518 = vmatpush3.msk.msra.mxu0 %vm282_vm1, %v2173_v15  ;;  %v2811_v31 = vld [vmem:[%s4108_s4 + $0xc] sm:$0x3f]  ;;  %v2812_v32 = vrot.slane %v3936_v11, 2  ;;  %v2889_v58 = vld [vmem:[%s4108_s4 + $0x12] sm:$0x3f]  ;;  %v2890_v33 = vrot.slane %v3936_v11, 3 }
 0x66b   : > { %3522 = vmatprep.subr.mxu1 %v3675_v13  ;;  %3519 = vmatprep.mubr.msk.f32.mxu0 %vm3676_vm3, %v3675_v13  ;;  %v2967_v34 = vld [vmem:[%s4108_s4 + $0x18] sm:$0x3f]  ;;  %v2968_v35 = vrot.slane %v3936_v11, 4  ;;  %v3045_v36 = vld [vmem:[%s4108_s4 + $0x1e] sm:$0x3f]  ;;  %v3046_v37 = vrot.slane %v3936_v11, 5 }
 0x66c   : > { %3523 = vmatpush3.msk.msra.mxu1 %vm282_vm1, %v2251_v17  ;;  %3520 = vmatmul.mubr.msk.f32.vlgmr.msra.gmra.mxu0 %vm275_vm2, %v2174_v16  ;;  %v3123_v38 = vld [vmem:[%s4108_s4 + $0x24] sm:$0x3f]  ;;  %v3124_v39 = vrot.slane %v3936_v11, 6  ;;  %v3201_v40 = vld [vmem:[%s4108_s4 + $0x2a] sm:$0x3f]  ;;  %v3202_v41 = vrot.slane %v3936_v11, 7 }
 0x66d   : > { %3524 = vmatprep.mubr.msk.f32.mxu1 %vm3676_vm3, %v3675_v13  ;;  %3527 = vmatprep.subr.mxu0 %v3675_v13  ;;  %v2016_v42 = vld [vmem:[%s4108_s4 + $0x30] sm:$0x1]  ;;  %vm2641_vm4 = vcmask 16384  }
 0x66e   : > { %3525 = vmatmul.mubr.msk.f32.vlgmr.msra.gmra.mxu1 %vm275_vm2, %v2252_v18  ;;  %3528 = vmatpush3.msk.msra.mxu0 %vm282_vm1, %v2329_v19  ;;  %v2654_v48 = vld [vmem:[%s4108_s4 + $0x30] sm:$0x1] }
 0x66f   : > { %3532 = vmatprep.subr.mxu1 %v3675_v13  ;;  %3529 = vmatprep.mubr.msk.f32.mxu0 %vm3676_vm3, %v3675_v13 }
 0x670   : > { %3533 = vmatpush3.msk.msra.mxu1 %vm282_vm1, %v2407_v22  ;;  %3530 = vmatmul.mubr.msk.f32.vlgmr.msra.gmra.mxu0 %vm275_vm2, %v2330_v20 }
 0x671   : > { %3534 = vmatprep.mubr.msk.f32.mxu1 %vm3676_vm3, %v3675_v13  ;;  %3537 = vmatprep.subr.mxu0 %v3675_v13 }
 0x672   : > { %3535 = vmatmul.mubr.msk.f32.vlgmr.msra.gmra.mxu1 %vm275_vm2, %v2408_v23  ;;  %3538 = vmatpush3.msk.msra.mxu0 %vm282_vm1, %v2485_v24 }
 0x673   : > { %3542 = vmatprep.subr.mxu1 %v3675_v13  ;;  %3539 = vmatprep.mubr.msk.f32.mxu0 %vm3676_vm3, %v3675_v13 }
 0x674   : > { %3543 = vmatpush3.msk.msra.mxu1 %vm282_vm1, %v2563_v26  ;;  %3540 = vmatmul.mubr.msk.f32.vlgmr.msra.gmra.mxu0 %vm275_vm2, %v2486_v25 }
 0x675   : > { %3544 = vmatprep.mubr.msk.f32.mxu1 %vm3676_vm3, %v3675_v13  ;;  %3547 = vmatprep.subr.mxu0 %v3675_v13 }
 0x676   : > { %3545 = vmatmul.mubr.msk.f32.vlgmr.msra.gmra.mxu1 %vm275_vm2, %v2564_v29  ;;  %3548 = vmatpush3.msk.msra.mxu0 %vm282_vm1, %v2655_v30 }
 0x677   : > { %3552 = vmatprep.subr.mxu1 %v3675_v13  ;;  %3549 = vmatprep.mubr.msk.f32.mxu0 %vm3676_vm3, %v3675_v13 }
 0x678   : > { %3553 = vmatpush3.msk.msra.mxu1 %vm282_vm1, %v2733_v56  ;;  %3550 = vmatmul.mubr.msk.f32.vlgmr.msra.gmra.mxu0 %vm275_vm2, %v3936_v11 }
 0x679   : > { %3554 = vmatprep.mubr.msk.f32.mxu1 %vm3676_vm3, %v3675_v13  ;;  %3557 = vmatprep.subr.mxu0 %v3675_v13 }
 0x67a   : > { %3555 = vmatmul.mubr.msk.f32.vlgmr.msra.gmra.mxu1 %vm275_vm2, %v2734_v57  ;;  %3558 = vmatpush3.msk.msra.mxu0 %vm282_vm1, %v2811_v31 }
 0x67b   : > { %3562 = vmatprep.subr.mxu1 %v3675_v13  ;;  %3559 = vmatprep.mubr.msk.f32.mxu0 %vm3676_vm3, %v3675_v13 }
 0x67c   : > { %3563 = vmatpush3.msk.msra.mxu1 %vm282_vm1, %v2889_v58  ;;  %3560 = vmatmul.mubr.msk.f32.vlgmr.msra.gmra.mxu0 %vm275_vm2, %v2812_v32 }
 0x67d   : > { %3564 = vmatprep.mubr.msk.f32.mxu1 %vm3676_vm3, %v3675_v13  ;;  %3567 = vmatprep.subr.mxu0 %v3675_v13 }
 0x67e   : > { %3565 = vmatmul.mubr.msk.f32.vlgmr.msra.gmra.mxu1 %vm275_vm2, %v2890_v33  ;;  %3568 = vmatpush3.msk.msra.mxu0 %vm282_vm1, %v2967_v34 }
 0x67f   : > { %3572 = vmatprep.subr.mxu1 %v3675_v13  ;;  %3569 = vmatprep.mubr.msk.f32.mxu0 %vm3676_vm3, %v3675_v13 }
 0x680   : > { %3573 = vmatpush3.msk.msra.mxu1 %vm282_vm1, %v3045_v36  ;;  %3570 = vmatmul.mubr.msk.f32.vlgmr.msra.gmra.mxu0 %vm275_vm2, %v2968_v35 }
 0x681   : > { %3574 = vmatprep.mubr.msk.f32.mxu1 %vm3676_vm3, %v3675_v13  ;;  %3577 = vmatprep.subr.mxu0 %v3675_v13 }
 0x682   : > { %3575 = vmatmul.mubr.msk.f32.vlgmr.msra.gmra.mxu1 %vm275_vm2, %v3046_v37  ;;  %3578 = vmatpush3.msk.msra.mxu0 %vm282_vm1, %v3123_v38 }
 0x683   : > { %3582 = vmatprep.subr.mxu1 %v3675_v13  ;;  %3579 = vmatprep.mubr.msk.f32.mxu0 %vm3676_vm3, %v3675_v13 }
 0x684   : > { %3583 = vmatpush3.msk.msra.mxu1 %vm282_vm1, %v3201_v40  ;;  %3580 = vmatmul.mubr.msk.f32.vlgmr.msra.gmra.mxu0 %vm275_vm2, %v3124_v39 }
 0x685   : > { %3584 = vmatprep.mubr.msk.f32.mxu1 %vm3676_vm3, %v3675_v13 }
 0x686   : > { %3585 = vmatmul.mubr.msk.f32.vlgmr.msra.gmra.mxu1 %vm275_vm2, %v3202_v41 }
 0x728   : > { %v2090_v1 = vpop.f32.mrf.mxu0 }
 0x729   : > { %v2094_v27 = vadd.f32 %v2090_v1, %v2016_v42 }
 0x72a   : > { %v2168_v43 = vpop.f32.mrf.mxu1  ;;  %v3511_v44 = vpop.f32.mrf.mxu0 }
 0x72b   : > { %v2172_v45 = vadd.f32 %v2168_v43, %v2094_v27 }
 0x72c   : > { %v3516_v50 = vpop.f32.mrf.mxu1  ;;  %v2246_v51 = vpop.f32.mrf.mxu0 }
 0x72d   : > { %v2250_v52 = vadd.f32 %v2246_v51, %v2172_v45 }
 0x72e   : > { %v2324_v53 = vpop.f32.mrf.mxu1  ;;  %v3521_v54 = vpop.f32.mrf.mxu0 }
 0x72f   : > { %v2328_v55 = vadd.f32 %v2324_v53, %v2250_v52 }
 0x730   : > { %v3526_v59 = vpop.f32.mrf.mxu1  ;;  %v2402_v60 = vpop.f32.mrf.mxu0 }
 0x731   : > { %v2406_v21 = vadd.f32 %v2402_v60, %v2328_v55 }
 0x732   : > { %v2480_v46 = vpop.f32.mrf.mxu1  ;;  %v3531_v61 = vpop.f32.mrf.mxu0 }
 0x733   : > { %v2484_v28 = vadd.f32 %v2480_v46, %v2406_v21 }
 0x734   : > { %v3536_v62 = vpop.f32.mrf.mxu1  ;;  %v2558_v47 = vpop.f32.mrf.mxu0 }
 0x735   : > { %v2562_v63 = vadd.f32 %v2558_v47, %v2484_v28 }
 0x736   : > { %v2636_v0 = vpop.f32.mrf.mxu1  ;;  %v3541_v2 = vpop.f32.mrf.mxu0 }
 0x737   : > { %v2640_v3 = vadd.f32 %v2636_v0, %v2562_v63 }
 0x738   : > { %v3546_v4 = vpop.f32.mrf.mxu1  ;;  %v2728_v5 = vpop.f32.mrf.mxu0 }
 0x739   : > { %v2732_v6 = vadd.f32 %v2728_v5, %v2654_v48  ;;  %v2642_v7 = vsel %vm2641_vm4, %v2640_v3, -inf }
 0x73a   : > { %v2806_v8 = vpop.f32.mrf.mxu1  ;;  %v3551_v9 = vpop.f32.mrf.mxu0  ;;  %2643 = vmax.xlane.f32.xlu0 %v2642_v7 }
 0x73b   : > { %v2810_v10 = vadd.f32 %v2806_v8, %v2732_v6 }
 0x73c   : > { %v3556_v11 = vpop.f32.mrf.mxu1  ;;  %v2884_v49 = vpop.f32.mrf.mxu0 }
 0x73d   : > { %v2888_v12 = vadd.f32 %v2884_v49, %v2810_v10 }
 0x73e   : > { %v2962_v13 = vpop.f32.mrf.mxu1  ;;  %v3561_v14 = vpop.f32.mrf.mxu0 }
 0x73f   : > { %v2966_v15 = vadd.f32 %v2962_v13, %v2888_v12 }
 0x740   : > { %v3566_v16 = vpop.f32.mrf.mxu1  ;;  %v3040_v17 = vpop.f32.mrf.mxu0 }
 0x741   : > { %v3044_v18 = vadd.f32 %v3040_v17, %v2966_v15 }
 0x742   : > { %v3118_v19 = vpop.f32.mrf.mxu1  ;;  %v3571_v20 = vpop.f32.mrf.mxu0 }
 0x743   : > { %v3122_v22 = vadd.f32 %v3118_v19, %v3044_v18 }
 0x744   : > { %v3576_v23 = vpop.f32.mrf.mxu1  ;;  %v3196_v24 = vpop.f32.mrf.mxu0 }
 0x745   : > { %v3200_v25 = vadd.f32 %v3196_v24, %v3122_v22 }
 0x746   : > { %v3274_v26 = vpop.f32.mrf.mxu1  ;;  %v3581_v29 = vpop.f32.mrf.mxu0 }
 0x747   : > { %v3278_v30 = vadd.f32 %v3274_v26, %v3200_v25 }
 0x748   : > { %v3586_v56 = vpop.f32.mrf.mxu1 }
 0x749   : > { %v3279_v57 = vsel %vm2641_vm4, %v3278_v30, -inf }
 0x74a   : > { %3280 = vmax.xlane.f32.xlu0 %v3279_v57 }
 0x7c3   : > { %v2644_v31 = vpop.xlane.xlu0 %2643 }
 0x7c4   : > { %v2645_v32 = vsub.f32 %v2640_v3, %v2644_v31 }
 0x7c6   : > { %v2646_v58 = vmul.f32 1.442695, %v2645_v32 }
 0x7c8   : > { %3628 = vpow2.f32 %v2646_v58 }
 0x7d3   : > { %v3281_v33 = vpop.xlane.xlu0 %3280 }
 0x7d4   : > { %v3282_v34 = vsub.f32 %v3278_v30, %v3281_v33 }
 0x7d5   : > { %v3629_v35 = vpop.eup %3628 }
 0x7d6   : > { %v3283_v36 = vmul.f32 1.442695, %v3282_v34  ;;  %v2648_v37 = vsel %vm2641_vm4, %v3629_v35, 0.0 }
 0x7d7   : > { %2649 = vadd.xlane.f32.xlu1 %v2648_v37 }
 0x7d8   : > { %3630 = vpow2.f32 %v3283_v36 }
 0x7e5   : > { %v3631_v38 = vpop.eup %3630 }
 0x7e6   : > { %v3285_v39 = vsel %vm2641_vm4, %v3631_v38, 0.0 }
 0x7e7   : > { %3286 = vadd.xlane.f32.xlu1 %v3285_v39 }
 0x860   : > { %v2650_v40 = vpop.xlane.xlu1 %2649 }
 0x861   : > { %3632 = vrcp.f32 %v2650_v40 }
 0x86e   : > { %v3633_v41 = vpop.eup %3632 }
 0x86f   : > { %v2652_v42 = vmul.f32 %v3633_v41, %v3629_v35 }
 0x870   : > { %v3287_v1 = vpop.xlane.xlu1 %3286 }
 0x871   : > { %2653 = vst.msk [vmem:[#allocation4] sm:$0x1] %vm2641_vm4, %v2652_v42  ;;  %3634 = vrcp.f32 %v3287_v1 }
 0x87e   : > { %v3635_v27 = vpop.eup %3634 }
 0x87f   : > { %v3289_v43 = vmul.f32 %v3635_v27, %v3631_v38 }
 0x881   : > { %3290 = vst.msk [vmem:[#allocation4 + $0x1] sm:$0x1] %vm2641_vm4, %v3289_v43 }
 0x882 PF: > { %p3592_p6 = scmp.eq.s32.totalorder %s3714_s19, 1  ;;  %s3677_s28 = smov [#allocation4]  }
 0x883   : > { %s3298_s29 = sshll.u32 %s3677_s28, 4  ;;  %s3299_s29 = int_to_ptr.vmem [resolvable:$true] %s3298_s29 }
 0x884   : > { %s3636_s30 = scalar_lea.vmem %s3299_s29, 32  ;;  %p3643_p10 = scmp.lt.s32.totalorder %s3299_s29, %s3299_s29 }
 0x885   : > { %p3637_p7 = scmp.ne.s32.totalorder %s3299_s29, %s3636_s30  ;;  %p3644_p11 = scmp.lt.s32.totalorder %s3636_s30, %s3636_s30 }
 0x887   : > { %p3638_p8 = pnand %p3637_p7, %p3592_p6  ;;  %p3645_p12 = por %p3644_p11, %p3643_p10 }
 0x889   : > { %p3639_p9 = pneg %p3638_p8 }
 0x88b   : > { %p3646_p13 = pnand %p3645_p12, %p3639_p9 }
 0x88d   : > { %3649 = shalt.err (!%p3646_p13)
}
 0x88e   : > { %3589 = dma.vmem_to_hbm [thread:$0]  (%p3592_p6), %s3299_s29, 32, %s4109_s5, [#allocation5]  }
 0x88f   : > { %3665 = dma.done.wait (%p3592_p6), [#allocation5], 32  }
 0x890   : > { %3667 = vsyncadd (%p3592_p6), [#allocation5], 4294967264 }
 0x891 PF: > { %s16_s18 = sadd.s32 1, %s3670_s18  }
 0x892   : > { %p13_p0 = scmp.ge.s32.totalorder %s16_s18, 4  }
 0x894   :  { %15 = sbr.rel (!%p13_p0) target bundleno = 1 (0x1), region = 83 }
 0x899   :  { %3311 = vsyncpa [#allocation5], 1 }
 0x89a   :  { %3313 = vsyncpa [#allocation5 + $0x1], 1 }

</bundles_post_ra>
